<compile_context>
chip_gen: v7x
topology: tpu7x:2x2x1
jax: 0.10.0
libtpu: 0.0.40
codegen_flags: <defaults>
</compile_context>

<pallas_src>
import jax
import jax.numpy as jnp
from jax.experimental import pallas as pl
from jax.experimental.pallas import tpu as pltpu


# ----------------------------- fused Pallas kernel ------------------------------

def _fused_cbam_kernel(obj_ref, frm_ref, dep_ref,
                       wo_ref, wf_ref, wd_ref, fb_ref,
                       w1_ref, b1_ref, w2_ref, b2_ref,
                       wab_ref, r_ref, cb_ref,
                       o_ref):
    # One batch element, channels-last: obj (T, N, D), frame (T, 1, D), depth (T, N, d).
    T, N, D = obj_ref.shape
    d = dep_ref.shape[-1]
    f32 = jnp.float32

    obj2d = obj_ref[...].reshape(T * N, D)
    dep2d = dep_ref[...].reshape(T * N, d)
    frm2d = frm_ref[...].reshape(T, D)

    # ---------------- fused FC:  concat([obj, frame, depth]) @ fc_w + fc_b ----------------
    # fc_w is split so the concat never exists; frame contribution computed once per T row.
    y2d = (jnp.dot(obj2d, wo_ref[...], preferred_element_type=f32)
           + jnp.dot(dep2d, wd_ref[...], preferred_element_type=f32)
           + fb_ref[...])                                                  # (T*N, D)
    y_frm = jnp.dot(frm2d, wf_ref[...], preferred_element_type=f32)        # (T, D)
    y = y2d.reshape(T, N, D) + y_frm.reshape(T, 1, D)                      # (T, N, D)
    y2d = y.reshape(T * N, D)

    # ---------------- channel attention (reduce over spatial T*N) ----------------
    avg_c = jnp.mean(y2d, axis=0, keepdims=True)                           # (1, D)
    max_c = jnp.max(y2d, axis=0, keepdims=True)                            # (1, D)
    # Stack avg/max into a (2, D) LHS so the shared MLP runs in one matmul pass.
    row = jax.lax.broadcasted_iota(jnp.int32, (2, D), 0)
    stats = jnp.where(row == 0,
                      jnp.broadcast_to(avg_c, (2, D)),
                      jnp.broadcast_to(max_c, (2, D)))                     # (2, D)
    h = jnp.maximum(
        jnp.dot(stats, w1_ref[...], preferred_element_type=f32) + b1_ref[...], 0.0)
    z = jnp.dot(h, w2_ref[...], preferred_element_type=f32) + b2_ref[...]  # (2, D)
    ch_scale = jax.nn.sigmoid(jnp.sum(z, axis=0, keepdims=True))           # (1, D)
    x1 = y * ch_scale.reshape(1, 1, D)                                     # (T, N, D)

    # ---------------- spatial attention (reduce over channels D) ----------------
    # Lane-dense (T, N) maps.  7x7 conv (2 in-ch, 1 out-ch, pad=3) expressed as
    #   conv = sum_kh  R_kh @ ([avg | max] @ Wab_kh)
    # with banded matrices built wrapper-side: all window shifts become MXU matmuls.
    avg_sp = jnp.mean(x1, axis=2)                                          # (T, N)
    max_sp = jnp.max(x1, axis=2)                                           # (T, N)
    sm = jnp.concatenate([avg_sp, max_sp], axis=1)                         # (T, 2N) lane concat

    conv = jnp.zeros((T, N), f32)
    for kh in range(7):  # unrolled at trace time
        mixed = jnp.dot(sm, wab_ref[kh], preferred_element_type=f32)       # (T, N)
        conv = conv + jnp.dot(r_ref[kh], mixed, preferred_element_type=f32)  # (T, N)

    sp_scale = jax.nn.sigmoid(conv + cb_ref[0])                            # (T, N)
    o_ref[...] = x1 * sp_scale[:, :, None]                                 # broadcast over D


# ------------------------------ JAX wrappers --------------------------------

def _conv_as_matmuls(conv_w, T, N):
    """Rewrite Conv2d(2, 1, 7, padding=3) cross-correlation as banded matmuls.

    conv_w: flattened (2*7*7,) weight; channel 0 multiplies the avg map, channel 1 the max map.
    Returns Wab (7, 2N, N), R (7, T, T) such that
        conv_out = sum_kh R_kh @ ([avg | max] @ Wab_kh).
    """
    cw = conv_w.reshape(2, 7, 7)                             # (channel, kh, kw)
    n_in = jnp.arange(N)[:, None]
    n_out = jnp.arange(N)[None, :]
    kw_idx = n_in - n_out + 3                                # kw s.t. n_in = n_out + kw - 3
    valid = (kw_idx >= 0) & (kw_idx <= 6)
    wcol = jnp.where(valid[None, None, :, :],
                     cw[:, :, jnp.clip(kw_idx, 0, 6)], 0.0)  # (2, 7, N, N)
    wab = jnp.concatenate([wcol[0], wcol[1]], axis=1)        # (7, 2N, N): [Wa; Wm] per kh
    t_out = jnp.arange(T)[:, None]
    t_in = jnp.arange(T)[None, :]
    r = jnp.stack([t_in == t_out + kh - 3 for kh in range(7)],
                  axis=0).astype(jnp.float32)                # (7, T, T): zero-padded row shift
    return wab, r


def cbam_spatial_attention_module(F_obj, F_frame, F_depth, p):
    """F_obj (B,T,N,D), F_frame (B,T,1,D), F_depth (B,T,N,d) -> (B,T,N,D)."""
    B, T, N, D = F_obj.shape
    d = F_depth.shape[-1]
    H = p["mlp_w1"].shape[1]

    # Split the fc weight so the (B,T,N,2D+d) concat temp never touches HBM.
    w_obj = p["fc_w"][:D]
    w_frm = p["fc_w"][D:2 * D]
    w_dep = p["fc_w"][2 * D:]

    wab, r = _conv_as_matmuls(p["conv_w"], T, N)

    const2 = lambda b: (0, 0)
    const3 = lambda b: (0, 0, 0)

    return pl.pallas_call(
        _fused_cbam_kernel,
        out_shape=jax.ShapeDtypeStruct((B, T, N, D), jnp.float32),
        grid=(B,),
        in_specs=[
            pl.BlockSpec((None, T, N, D), lambda b: (b, 0, 0, 0)),   # F_obj
            pl.BlockSpec((None, T, 1, D), lambda b: (b, 0, 0, 0)),   # F_frame
            pl.BlockSpec((None, T, N, d), lambda b: (b, 0, 0, 0)),   # F_depth
            pl.BlockSpec((D, D), const2),                            # w_obj
            pl.BlockSpec((D, D), const2),                            # w_frame
            pl.BlockSpec((d, D), const2),                            # w_depth
            pl.BlockSpec((1, D), const2),                            # fc bias
            pl.BlockSpec((D, H), const2),                            # mlp w1
            pl.BlockSpec((1, H), const2),                            # mlp b1
            pl.BlockSpec((H, D), const2),                            # mlp w2
            pl.BlockSpec((1, D), const2),                            # mlp b2
            pl.BlockSpec((7, 2 * N, N), const3),                     # conv col-band [Wa; Wm]
            pl.BlockSpec((7, T, T), const3),                         # conv row-shift matrices
            pl.BlockSpec(memory_space=pltpu.MemorySpace.SMEM),       # conv bias (1,)
        ],
        out_specs=pl.BlockSpec((None, T, N, D), lambda b: (b, 0, 0, 0)),
        compiler_params=pltpu.CompilerParams(
            dimension_semantics=("parallel",),
            vmem_limit_bytes=32 * 1024 * 1024,
        ),
    )(F_obj, F_frame, F_depth, w_obj, w_frm, w_dep, p["fc_b"],
      p["mlp_w1"], p["mlp_b1"], p["mlp_w2"], p["mlp_b2"],
      wab, r, p["conv_b"])


# ------------------------- deterministic parameters -------------------------

def init_params(key, feature_dim, depth_dim):
    D, d = feature_dim, depth_dim
    Cin = 2 * D + d
    H = D // 16  # reduction_ratio = 16
    ks = jax.random.split(key, 8)
    s = 0.1
    return {
        "fc_w":   jax.random.normal(ks[0], (Cin, D), jnp.float32) * s,
        "fc_b":   jax.random.normal(ks[1], (1, D), jnp.float32) * s,
        "mlp_w1": jax.random.normal(ks[2], (D, H), jnp.float32) * s,
        "mlp_b1": jax.random.normal(ks[3], (1, H), jnp.float32) * s,
        "mlp_w2": jax.random.normal(ks[4], (H, D), jnp.float32) * s,
        "mlp_b2": jax.random.normal(ks[5], (1, D), jnp.float32) * s,
        # Conv2d(2,1,7) weight (1,2,7,7) flattened as (c, kh, kw); c0=avg map, c1=max map.
        "conv_w": jax.random.normal(ks[6], (2 * 7 * 7,), jnp.float32) * s,
        "conv_b": jax.random.normal(ks[7], (1,), jnp.float32) * s,
    }


# ------------------------------ pure-JAX reference ------------------------------

def reference(F_obj, F_frame, F_depth, p):
    B, T, N, D = F_obj.shape
    comb = jnp.concatenate(
        [F_obj, jnp.broadcast_to(F_frame, (B, T, N, D)), F_depth], axis=-1)
    y = comb @ p["fc_w"] + p["fc_b"][0]
    # channel attention
    avg_c = jnp.mean(y, axis=(1, 2))
    max_c = jnp.max(y, axis=(1, 2))

    def mlp(v):
        return jnp.maximum(v @ p["mlp_w1"] + p["mlp_b1"][0], 0.0) @ p["mlp_w2"] + p["mlp_b2"][0]

    ch = jax.nn.sigmoid(mlp(avg_c) + mlp(max_c))
    x1 = y * ch[:, None, None, :]
    # spatial attention
    maps = jnp.stack([jnp.mean(x1, axis=3), jnp.max(x1, axis=3)], axis=1)   # (B,2,T,N)
    cw = p["conv_w"].reshape(1, 2, 7, 7)
    conv = jax.lax.conv_general_dilated(
        maps, cw, (1, 1), [(3, 3), (3, 3)],
        dimension_numbers=("NCHW", "OIHW", "NCHW"))                          # (B,1,T,N)
    s = jax.nn.sigmoid(conv[:, 0] + p["conv_b"][0])
    return x1 * s[:, :, :, None]


# ----------------------------------- main -----------------------------------

if __name__ == "__main__":
    B, T, N = 2, 8, 8
    feature_dim, depth_dim = 32, 8

    key = jax.random.PRNGKey(0)
    k1, k2, k3, kp = jax.random.split(key, 4)
    F_obj = jax.random.normal(k1, (B, T, N, feature_dim), jnp.float32)
    F_frame = jax.random.normal(k2, (B, T, 1, feature_dim), jnp.float32)
    F_depth = jax.random.normal(k3, (B, T, N, depth_dim), jnp.float32)
    params = init_params(kp, feature_dim, depth_dim)

    out = cbam_spatial_attention_module(F_obj, F_frame, F_depth, params)
    out = jax.block_until_ready(out)

    ref = reference(F_obj, F_frame, F_depth, params)
    assert out.shape == (B, T, N, feature_dim), out.shape
    max_err = float(jnp.max(jnp.abs(out - ref)))
    assert jnp.allclose(out, ref, rtol=1e-2, atol=1e-2), f"max_err={max_err}"

    print("KERNEL_OK")
</pallas_src>

<mosaic_0001>
module attributes {stable_mosaic.version = 11 : i64} {
  func.func @_fused_cbam_kernel(%arg0: i32, %arg1: memref<1x8x8x32xf32, #tpu.memory_space<vmem>>, %arg2: memref<1x8x1x32xf32, #tpu.memory_space<vmem>>, %arg3: memref<1x8x8x8xf32, #tpu.memory_space<vmem>>, %arg4: memref<32x32xf32, #tpu.memory_space<vmem>>, %arg5: memref<32x32xf32, #tpu.memory_space<vmem>>, %arg6: memref<8x32xf32, #tpu.memory_space<vmem>>, %arg7: memref<1x32xf32, #tpu.memory_space<vmem>>, %arg8: memref<32x2xf32, #tpu.memory_space<vmem>>, %arg9: memref<1x2xf32, #tpu.memory_space<vmem>>, %arg10: memref<2x32xf32, #tpu.memory_space<vmem>>, %arg11: memref<1x32xf32, #tpu.memory_space<vmem>>, %arg12: memref<7x16x8xf32, #tpu.memory_space<vmem>>, %arg13: memref<7x8x8xf32, #tpu.memory_space<vmem>>, %arg14: memref<1xf32, #tpu.memory_space<smem>>, %arg15: memref<1x8x8x32xf32, #tpu.memory_space<vmem>>) attributes {dimension_semantics = [#tpu.dimension_semantics<parallel>], iteration_bounds = array<i64: 2>, scalar_prefetch = 0 : i64, scratch_operands = 0 : i64, tpu.core_type = #tpu.core_type<tc>, window_params = [{transform_indices = @transform_0, window_bounds = array<i64: 1, 8, 8, 32>}, {transform_indices = @transform_1, window_bounds = array<i64: 1, 8, 1, 32>}, {transform_indices = @transform_2, window_bounds = array<i64: 1, 8, 8, 8>}, {pipeline_mode = #tpu.pipeline_mode<synchronous>, transform_indices = @transform_3, window_bounds = array<i64: 32, 32>}, {pipeline_mode = #tpu.pipeline_mode<synchronous>, transform_indices = @transform_4, window_bounds = array<i64: 32, 32>}, {pipeline_mode = #tpu.pipeline_mode<synchronous>, transform_indices = @transform_5, window_bounds = array<i64: 8, 32>}, {pipeline_mode = #tpu.pipeline_mode<synchronous>, transform_indices = @transform_6, window_bounds = array<i64: 1, 32>}, {pipeline_mode = #tpu.pipeline_mode<synchronous>, transform_indices = @transform_7, window_bounds = array<i64: 32, 2>}, {pipeline_mode = #tpu.pipeline_mode<synchronous>, transform_indices = @transform_8, window_bounds = array<i64: 1, 2>}, {pipeline_mode = #tpu.pipeline_mode<synchronous>, transform_indices = @transform_9, window_bounds = array<i64: 2, 32>}, {pipeline_mode = #tpu.pipeline_mode<synchronous>, transform_indices = @transform_10, window_bounds = array<i64: 1, 32>}, {pipeline_mode = #tpu.pipeline_mode<synchronous>, transform_indices = @transform_11, window_bounds = array<i64: 7, 16, 8>}, {pipeline_mode = #tpu.pipeline_mode<synchronous>, transform_indices = @transform_12, window_bounds = array<i64: 7, 8, 8>}, {transform_indices = @transform_13, window_bounds = array<i64: 1>}, {transform_indices = @transform_14, window_bounds = array<i64: 1, 8, 8, 32>}]} {
    %c0 = arith.constant 0 : index
    %c0_0 = arith.constant 0 : index
    %c0_1 = arith.constant 0 : index
    %c0_2 = arith.constant 0 : index
    %0 = vector.load %arg1[%c0, %c0_0, %c0_1, %c0_2] : memref<1x8x8x32xf32, #tpu.memory_space<vmem>>, vector<1x8x8x32xf32>
    %1 = vector.shape_cast %0 : vector<1x8x8x32xf32> to vector<8x8x32xf32>
    %2 = vector.shape_cast %1 : vector<8x8x32xf32> to vector<64x32xf32>
    %c0_3 = arith.constant 0 : index
    %c0_4 = arith.constant 0 : index
    %c0_5 = arith.constant 0 : index
    %c0_6 = arith.constant 0 : index
    %3 = vector.load %arg3[%c0_3, %c0_4, %c0_5, %c0_6] : memref<1x8x8x8xf32, #tpu.memory_space<vmem>>, vector<1x8x8x8xf32>
    %4 = vector.shape_cast %3 : vector<1x8x8x8xf32> to vector<8x8x8xf32>
    %5 = vector.shape_cast %4 : vector<8x8x8xf32> to vector<64x8xf32>
    %c0_7 = arith.constant 0 : index
    %c0_8 = arith.constant 0 : index
    %c0_9 = arith.constant 0 : index
    %c0_10 = arith.constant 0 : index
    %6 = vector.load %arg2[%c0_7, %c0_8, %c0_9, %c0_10] : memref<1x8x1x32xf32, #tpu.memory_space<vmem>>, vector<1x8x1x32xf32>
    %7 = vector.shape_cast %6 : vector<1x8x1x32xf32> to vector<8x1x32xf32>
    %8 = vector.shape_cast %7 : vector<8x1x32xf32> to vector<8x32xf32>
    %c0_11 = arith.constant 0 : index
    %c0_12 = arith.constant 0 : index
    %9 = vector.load %arg4[%c0_11, %c0_12] : memref<32x32xf32, #tpu.memory_space<vmem>>, vector<32x32xf32>
    %cst = arith.constant dense<0.000000e+00> : vector<64x32xf32>
    %10 = tpu.matmul %2, %9, %cst {dimension_numbers = #tpu.dot_dimension_numbers<[1], [0], [0], [1], [0, 0, 1, 1], [], []>} : vector<64x32xf32>, vector<32x32xf32>, vector<64x32xf32> -> vector<64x32xf32>
    %c0_13 = arith.constant 0 : index
    %c0_14 = arith.constant 0 : index
    %11 = vector.load %arg6[%c0_13, %c0_14] : memref<8x32xf32, #tpu.memory_space<vmem>>, vector<8x32xf32>
    %cst_15 = arith.constant dense<0.000000e+00> : vector<64x32xf32>
    %12 = tpu.matmul %5, %11, %cst_15 {dimension_numbers = #tpu.dot_dimension_numbers<[1], [0], [0], [1], [0, 0, 1, 1], [], []>} : vector<64x8xf32>, vector<8x32xf32>, vector<64x32xf32> -> vector<64x32xf32>
    %13 = arith.addf %10, %12 : vector<64x32xf32>
    %c0_16 = arith.constant 0 : index
    %c0_17 = arith.constant 0 : index
    %14 = vector.load %arg7[%c0_16, %c0_17] : memref<1x32xf32, #tpu.memory_space<vmem>>, vector<1x32xf32>
    %15 = vector.broadcast %14 : vector<1x32xf32> to vector<64x32xf32>
    %16 = arith.addf %13, %15 : vector<64x32xf32>
    %c0_18 = arith.constant 0 : index
    %c0_19 = arith.constant 0 : index
    %17 = vector.load %arg5[%c0_18, %c0_19] : memref<32x32xf32, #tpu.memory_space<vmem>>, vector<32x32xf32>
    %cst_20 = arith.constant dense<0.000000e+00> : vector<8x32xf32>
    %18 = tpu.matmul %8, %17, %cst_20 {dimension_numbers = #tpu.dot_dimension_numbers<[1], [0], [0], [1], [0, 0, 1, 1], [], []>} : vector<8x32xf32>, vector<32x32xf32>, vector<8x32xf32> -> vector<8x32xf32>
    %19 = vector.shape_cast %16 : vector<64x32xf32> to vector<8x8x32xf32>
    %20 = vector.shape_cast %18 : vector<8x32xf32> to vector<8x1x32xf32>
    %21 = vector.broadcast %20 : vector<8x1x32xf32> to vector<8x8x32xf32>
    %22 = arith.addf %19, %21 : vector<8x8x32xf32>
    %23 = vector.shape_cast %22 : vector<8x8x32xf32> to vector<64x32xf32>
    %cst_21 = arith.constant dense<0.000000e+00> : vector<32xf32>
    %24 = vector.multi_reduction <add>, %23, %cst_21 [0] : vector<64x32xf32> to vector<32xf32>
    %25 = vector.shape_cast %24 : vector<32xf32> to vector<1x32xf32>
    %cst_22 = arith.constant 6.400000e+01 : f32
    %26 = vector.broadcast %cst_22 : f32 to vector<1x32xf32>
    %27 = arith.divf %25, %26 : vector<1x32xf32>
    %cst_23 = arith.constant dense<0xFF800000> : vector<32xf32>
    %28 = vector.multi_reduction <maximumf>, %23, %cst_23 [0] : vector<64x32xf32> to vector<32xf32>
    %29 = vector.shape_cast %28 : vector<32xf32> to vector<1x32xf32>
    %30 = tpu.iota {dimensions = array<i32: 0>} : vector<2x32xi32>
    %c0_i32 = arith.constant 0 : i32
    %31 = vector.broadcast %c0_i32 : i32 to vector<2x32xi32>
    %32 = arith.cmpi eq, %30, %31 : vector<2x32xi32>
    %33 = vector.shape_cast %27 : vector<1x32xf32> to vector<1x32xf32>
    %34 = vector.broadcast %33 : vector<1x32xf32> to vector<2x32xf32>
    %35 = vector.shape_cast %29 : vector<1x32xf32> to vector<1x32xf32>
    %36 = vector.broadcast %35 : vector<1x32xf32> to vector<2x32xf32>
    %37 = arith.select %32, %34, %36 : vector<2x32xi1>, vector<2x32xf32>
    %c0_24 = arith.constant 0 : index
    %c0_25 = arith.constant 0 : index
    %38 = vector.load %arg8[%c0_24, %c0_25] : memref<32x2xf32, #tpu.memory_space<vmem>>, vector<32x2xf32>
    %cst_26 = arith.constant dense<0.000000e+00> : vector<2x2xf32>
    %39 = tpu.matmul %37, %38, %cst_26 {dimension_numbers = #tpu.dot_dimension_numbers<[1], [0], [0], [1], [0, 0, 1, 1], [], []>} : vector<2x32xf32>, vector<32x2xf32>, vector<2x2xf32> -> vector<2x2xf32>
    %c0_27 = arith.constant 0 : index
    %c0_28 = arith.constant 0 : index
    %40 = vector.load %arg9[%c0_27, %c0_28] : memref<1x2xf32, #tpu.memory_space<vmem>>, vector<1x2xf32>
    %41 = vector.broadcast %40 : vector<1x2xf32> to vector<2x2xf32>
    %42 = arith.addf %39, %41 : vector<2x2xf32>
    %cst_29 = arith.constant 0.000000e+00 : f32
    %43 = vector.broadcast %cst_29 : f32 to vector<2x2xf32>
    %44 = arith.maximumf %42, %43 : vector<2x2xf32>
    %c0_30 = arith.constant 0 : index
    %c0_31 = arith.constant 0 : index
    %45 = vector.load %arg10[%c0_30, %c0_31] : memref<2x32xf32, #tpu.memory_space<vmem>>, vector<2x32xf32>
    %cst_32 = arith.constant dense<0.000000e+00> : vector<2x32xf32>
    %46 = tpu.matmul %44, %45, %cst_32 {dimension_numbers = #tpu.dot_dimension_numbers<[1], [0], [0], [1], [0, 0, 1, 1], [], []>} : vector<2x2xf32>, vector<2x32xf32>, vector<2x32xf32> -> vector<2x32xf32>
    %c0_33 = arith.constant 0 : index
    %c0_34 = arith.constant 0 : index
    %47 = vector.load %arg11[%c0_33, %c0_34] : memref<1x32xf32, #tpu.memory_space<vmem>>, vector<1x32xf32>
    %48 = vector.broadcast %47 : vector<1x32xf32> to vector<2x32xf32>
    %49 = arith.addf %46, %48 : vector<2x32xf32>
    %cst_35 = arith.constant dense<0.000000e+00> : vector<32xf32>
    %50 = vector.multi_reduction <add>, %49, %cst_35 [0] : vector<2x32xf32> to vector<32xf32>
    %51 = vector.shape_cast %50 : vector<32xf32> to vector<1x32xf32>
    %52 = arith.negf %51 : vector<1x32xf32>
    %53 = math.exp %52 : vector<1x32xf32>
    %cst_36 = arith.constant 1.000000e+00 : f32
    %54 = vector.broadcast %cst_36 : f32 to vector<1x32xf32>
    %55 = arith.addf %54, %53 : vector<1x32xf32>
    %56 = arith.divf %54, %55 : vector<1x32xf32>
    %57 = vector.shape_cast %56 : vector<1x32xf32> to vector<1x1x32xf32>
    %58 = vector.broadcast %57 : vector<1x1x32xf32> to vector<8x8x32xf32>
    %59 = arith.mulf %22, %58 : vector<8x8x32xf32>
    %cst_37 = arith.constant dense<0.000000e+00> : vector<8x8xf32>
    %60 = vector.multi_reduction <add>, %59, %cst_37 [2] : vector<8x8x32xf32> to vector<8x8xf32>
    %cst_38 = arith.constant 3.200000e+01 : f32
    %61 = vector.broadcast %cst_38 : f32 to vector<8x8xf32>
    %62 = arith.divf %60, %61 : vector<8x8xf32>
    %cst_39 = arith.constant dense<0xFF800000> : vector<8x8xf32>
    %63 = vector.multi_reduction <maximumf>, %59, %cst_39 [2] : vector<8x8x32xf32> to vector<8x8xf32>
    %64 = tpu.concatenate %62, %63 in 1 : vector<8x8xf32>, vector<8x8xf32> -> vector<8x16xf32>
    %cst_40 = arith.constant 0.000000e+00 : f32
    %65 = vector.broadcast %cst_40 : f32 to vector<8x8xf32>
    %c0_41 = arith.constant 0 : index
    %c0_42 = arith.constant 0 : index
    %c0_43 = arith.constant 0 : index
    %66 = vector.load %arg12[%c0_41, %c0_42, %c0_43] : memref<7x16x8xf32, #tpu.memory_space<vmem>>, vector<1x16x8xf32>
    %67 = vector.shape_cast %66 : vector<1x16x8xf32> to vector<16x8xf32>
    %cst_44 = arith.constant dense<0.000000e+00> : vector<8x8xf32>
    %68 = tpu.matmul %64, %67, %cst_44 {dimension_numbers = #tpu.dot_dimension_numbers<[1], [0], [0], [1], [0, 0, 1, 1], [], []>} : vector<8x16xf32>, vector<16x8xf32>, vector<8x8xf32> -> vector<8x8xf32>
    %c0_45 = arith.constant 0 : index
    %c0_46 = arith.constant 0 : index
    %c0_47 = arith.constant 0 : index
    %69 = vector.load %arg13[%c0_45, %c0_46, %c0_47] : memref<7x8x8xf32, #tpu.memory_space<vmem>>, vector<1x8x8xf32>
    %70 = vector.shape_cast %69 : vector<1x8x8xf32> to vector<8x8xf32>
    %cst_48 = arith.constant dense<0.000000e+00> : vector<8x8xf32>
    %71 = tpu.matmul %70, %68, %cst_48 {dimension_numbers = #tpu.dot_dimension_numbers<[1], [0], [0], [1], [0, 0, 1, 1], [], []>} : vector<8x8xf32>, vector<8x8xf32>, vector<8x8xf32> -> vector<8x8xf32>
    %72 = arith.addf %65, %71 : vector<8x8xf32>
    %c1 = arith.constant 1 : index
    %c0_49 = arith.constant 0 : index
    %c0_50 = arith.constant 0 : index
    %73 = vector.load %arg12[%c1, %c0_49, %c0_50] : memref<7x16x8xf32, #tpu.memory_space<vmem>>, vector<1x16x8xf32>
    %74 = vector.shape_cast %73 : vector<1x16x8xf32> to vector<16x8xf32>
    %cst_51 = arith.constant dense<0.000000e+00> : vector<8x8xf32>
    %75 = tpu.matmul %64, %74, %cst_51 {dimension_numbers = #tpu.dot_dimension_numbers<[1], [0], [0], [1], [0, 0, 1, 1], [], []>} : vector<8x16xf32>, vector<16x8xf32>, vector<8x8xf32> -> vector<8x8xf32>
    %c1_52 = arith.constant 1 : index
    %c0_53 = arith.constant 0 : index
    %c0_54 = arith.constant 0 : index
    %76 = vector.load %arg13[%c1_52, %c0_53, %c0_54] : memref<7x8x8xf32, #tpu.memory_space<vmem>>, vector<1x8x8xf32>
    %77 = vector.shape_cast %76 : vector<1x8x8xf32> to vector<8x8xf32>
    %cst_55 = arith.constant dense<0.000000e+00> : vector<8x8xf32>
    %78 = tpu.matmul %77, %75, %cst_55 {dimension_numbers = #tpu.dot_dimension_numbers<[1], [0], [0], [1], [0, 0, 1, 1], [], []>} : vector<8x8xf32>, vector<8x8xf32>, vector<8x8xf32> -> vector<8x8xf32>
    %79 = arith.addf %72, %78 : vector<8x8xf32>
    %c2 = arith.constant 2 : index
    %c0_56 = arith.constant 0 : index
    %c0_57 = arith.constant 0 : index
    %80 = vector.load %arg12[%c2, %c0_56, %c0_57] : memref<7x16x8xf32, #tpu.memory_space<vmem>>, vector<1x16x8xf32>
    %81 = vector.shape_cast %80 : vector<1x16x8xf32> to vector<16x8xf32>
    %cst_58 = arith.constant dense<0.000000e+00> : vector<8x8xf32>
    %82 = tpu.matmul %64, %81, %cst_58 {dimension_numbers = #tpu.dot_dimension_numbers<[1], [0], [0], [1], [0, 0, 1, 1], [], []>} : vector<8x16xf32>, vector<16x8xf32>, vector<8x8xf32> -> vector<8x8xf32>
    %c2_59 = arith.constant 2 : index
    %c0_60 = arith.constant 0 : index
    %c0_61 = arith.constant 0 : index
    %83 = vector.load %arg13[%c2_59, %c0_60, %c0_61] : memref<7x8x8xf32, #tpu.memory_space<vmem>>, vector<1x8x8xf32>
    %84 = vector.shape_cast %83 : vector<1x8x8xf32> to vector<8x8xf32>
    %cst_62 = arith.constant dense<0.000000e+00> : vector<8x8xf32>
    %85 = tpu.matmul %84, %82, %cst_62 {dimension_numbers = #tpu.dot_dimension_numbers<[1], [0], [0], [1], [0, 0, 1, 1], [], []>} : vector<8x8xf32>, vector<8x8xf32>, vector<8x8xf32> -> vector<8x8xf32>
    %86 = arith.addf %79, %85 : vector<8x8xf32>
    %c3 = arith.constant 3 : index
    %c0_63 = arith.constant 0 : index
    %c0_64 = arith.constant 0 : index
    %87 = vector.load %arg12[%c3, %c0_63, %c0_64] : memref<7x16x8xf32, #tpu.memory_space<vmem>>, vector<1x16x8xf32>
    %88 = vector.shape_cast %87 : vector<1x16x8xf32> to vector<16x8xf32>
    %cst_65 = arith.constant dense<0.000000e+00> : vector<8x8xf32>
    %89 = tpu.matmul %64, %88, %cst_65 {dimension_numbers = #tpu.dot_dimension_numbers<[1], [0], [0], [1], [0, 0, 1, 1], [], []>} : vector<8x16xf32>, vector<16x8xf32>, vector<8x8xf32> -> vector<8x8xf32>
    %c3_66 = arith.constant 3 : index
    %c0_67 = arith.constant 0 : index
    %c0_68 = arith.constant 0 : index
    %90 = vector.load %arg13[%c3_66, %c0_67, %c0_68] : memref<7x8x8xf32, #tpu.memory_space<vmem>>, vector<1x8x8xf32>
    %91 = vector.shape_cast %90 : vector<1x8x8xf32> to vector<8x8xf32>
    %cst_69 = arith.constant dense<0.000000e+00> : vector<8x8xf32>
    %92 = tpu.matmul %91, %89, %cst_69 {dimension_numbers = #tpu.dot_dimension_numbers<[1], [0], [0], [1], [0, 0, 1, 1], [], []>} : vector<8x8xf32>, vector<8x8xf32>, vector<8x8xf32> -> vector<8x8xf32>
    %93 = arith.addf %86, %92 : vector<8x8xf32>
    %c4 = arith.constant 4 : index
    %c0_70 = arith.constant 0 : index
    %c0_71 = arith.constant 0 : index
    %94 = vector.load %arg12[%c4, %c0_70, %c0_71] : memref<7x16x8xf32, #tpu.memory_space<vmem>>, vector<1x16x8xf32>
    %95 = vector.shape_cast %94 : vector<1x16x8xf32> to vector<16x8xf32>
    %cst_72 = arith.constant dense<0.000000e+00> : vector<8x8xf32>
    %96 = tpu.matmul %64, %95, %cst_72 {dimension_numbers = #tpu.dot_dimension_numbers<[1], [0], [0], [1], [0, 0, 1, 1], [], []>} : vector<8x16xf32>, vector<16x8xf32>, vector<8x8xf32> -> vector<8x8xf32>
    %c4_73 = arith.constant 4 : index
    %c0_74 = arith.constant 0 : index
    %c0_75 = arith.constant 0 : index
    %97 = vector.load %arg13[%c4_73, %c0_74, %c0_75] : memref<7x8x8xf32, #tpu.memory_space<vmem>>, vector<1x8x8xf32>
    %98 = vector.shape_cast %97 : vector<1x8x8xf32> to vector<8x8xf32>
    %cst_76 = arith.constant dense<0.000000e+00> : vector<8x8xf32>
    %99 = tpu.matmul %98, %96, %cst_76 {dimension_numbers = #tpu.dot_dimension_numbers<[1], [0], [0], [1], [0, 0, 1, 1], [], []>} : vector<8x8xf32>, vector<8x8xf32>, vector<8x8xf32> -> vector<8x8xf32>
    %100 = arith.addf %93, %99 : vector<8x8xf32>
    %c5 = arith.constant 5 : index
    %c0_77 = arith.constant 0 : index
    %c0_78 = arith.constant 0 : index
    %101 = vector.load %arg12[%c5, %c0_77, %c0_78] : memref<7x16x8xf32, #tpu.memory_space<vmem>>, vector<1x16x8xf32>
    %102 = vector.shape_cast %101 : vector<1x16x8xf32> to vector<16x8xf32>
    %cst_79 = arith.constant dense<0.000000e+00> : vector<8x8xf32>
    %103 = tpu.matmul %64, %102, %cst_79 {dimension_numbers = #tpu.dot_dimension_numbers<[1], [0], [0], [1], [0, 0, 1, 1], [], []>} : vector<8x16xf32>, vector<16x8xf32>, vector<8x8xf32> -> vector<8x8xf32>
    %c5_80 = arith.constant 5 : index
    %c0_81 = arith.constant 0 : index
    %c0_82 = arith.constant 0 : index
    %104 = vector.load %arg13[%c5_80, %c0_81, %c0_82] : memref<7x8x8xf32, #tpu.memory_space<vmem>>, vector<1x8x8xf32>
    %105 = vector.shape_cast %104 : vector<1x8x8xf32> to vector<8x8xf32>
    %cst_83 = arith.constant dense<0.000000e+00> : vector<8x8xf32>
    %106 = tpu.matmul %105, %103, %cst_83 {dimension_numbers = #tpu.dot_dimension_numbers<[1], [0], [0], [1], [0, 0, 1, 1], [], []>} : vector<8x8xf32>, vector<8x8xf32>, vector<8x8xf32> -> vector<8x8xf32>
    %107 = arith.addf %100, %106 : vector<8x8xf32>
    %c6 = arith.constant 6 : index
    %c0_84 = arith.constant 0 : index
    %c0_85 = arith.constant 0 : index
    %108 = vector.load %arg12[%c6, %c0_84, %c0_85] : memref<7x16x8xf32, #tpu.memory_space<vmem>>, vector<1x16x8xf32>
    %109 = vector.shape_cast %108 : vector<1x16x8xf32> to vector<16x8xf32>
    %cst_86 = arith.constant dense<0.000000e+00> : vector<8x8xf32>
    %110 = tpu.matmul %64, %109, %cst_86 {dimension_numbers = #tpu.dot_dimension_numbers<[1], [0], [0], [1], [0, 0, 1, 1], [], []>} : vector<8x16xf32>, vector<16x8xf32>, vector<8x8xf32> -> vector<8x8xf32>
    %c6_87 = arith.constant 6 : index
    %c0_88 = arith.constant 0 : index
    %c0_89 = arith.constant 0 : index
    %111 = vector.load %arg13[%c6_87, %c0_88, %c0_89] : memref<7x8x8xf32, #tpu.memory_space<vmem>>, vector<1x8x8xf32>
    %112 = vector.shape_cast %111 : vector<1x8x8xf32> to vector<8x8xf32>
    %cst_90 = arith.constant dense<0.000000e+00> : vector<8x8xf32>
    %113 = tpu.matmul %112, %110, %cst_90 {dimension_numbers = #tpu.dot_dimension_numbers<[1], [0], [0], [1], [0, 0, 1, 1], [], []>} : vector<8x8xf32>, vector<8x8xf32>, vector<8x8xf32> -> vector<8x8xf32>
    %114 = arith.addf %107, %113 : vector<8x8xf32>
    %c0_91 = arith.constant 0 : index
    %115 = memref.load %arg14[%c0_91] : memref<1xf32, #tpu.memory_space<smem>>
    %116 = vector.broadcast %115 : f32 to vector<8x8xf32>
    %117 = arith.addf %114, %116 : vector<8x8xf32>
    %118 = arith.negf %117 : vector<8x8xf32>
    %119 = math.exp %118 : vector<8x8xf32>
    %cst_92 = arith.constant 1.000000e+00 : f32
    %120 = vector.broadcast %cst_92 : f32 to vector<8x8xf32>
    %121 = arith.addf %120, %119 : vector<8x8xf32>
    %122 = arith.divf %120, %121 : vector<8x8xf32>
    %123 = vector.shape_cast %122 : vector<8x8xf32> to vector<8x8x1xf32>
    %124 = vector.broadcast %123 : vector<8x8x1xf32> to vector<8x8x32xf32>
    %125 = arith.mulf %59, %124 : vector<8x8x32xf32>
    %c0_93 = arith.constant 0 : index
    %c0_94 = arith.constant 0 : index
    %c0_95 = arith.constant 0 : index
    %c0_96 = arith.constant 0 : index
    %126 = vector.load %arg15[%c0_93, %c0_94, %c0_95, %c0_96] : memref<1x8x8x32xf32, #tpu.memory_space<vmem>>, vector<1x8x8x32xf32>
    %127 = vector.shape_cast %126 : vector<1x8x8x32xf32> to vector<8x8x32xf32>
    %128 = vector.shape_cast %125 : vector<8x8x32xf32> to vector<1x8x8x32xf32>
    tpu.vector_store %arg15[%c0_93, %c0_94, %c0_95, %c0_96], %128 {strides = array<i32>} : memref<1x8x8x32xf32, #tpu.memory_space<vmem>>, vector<1x8x8x32xf32>,
    return
  }
  func.func @transform_0(%arg0: i32) -> (i32, i32, i32, i32) {
    %c0_i32 = arith.constant 0 : i32
    %c0_i32_0 = arith.constant 0 : i32
    %c0_i32_1 = arith.constant 0 : i32
    %c0_i32_2 = arith.constant 0 : i32
    return %arg0, %c0_i32, %c0_i32_0, %c0_i32_1 : i32, i32, i32, i32
  }
  func.func @transform_1(%arg0: i32) -> (i32, i32, i32, i32) {
    %c0_i32 = arith.constant 0 : i32
    %c0_i32_0 = arith.constant 0 : i32
    %c0_i32_1 = arith.constant 0 : i32
    %c0_i32_2 = arith.constant 0 : i32
    return %arg0, %c0_i32, %c0_i32_0, %c0_i32_1 : i32, i32, i32, i32
  }
  func.func @transform_2(%arg0: i32) -> (i32, i32, i32, i32) {
    %c0_i32 = arith.constant 0 : i32
    %c0_i32_0 = arith.constant 0 : i32
    %c0_i32_1 = arith.constant 0 : i32
    %c0_i32_2 = arith.constant 0 : i32
    return %arg0, %c0_i32, %c0_i32_0, %c0_i32_1 : i32, i32, i32, i32
  }
  func.func @transform_3(%arg0: i32) -> (i32, i32) {
    %c0_i32 = arith.constant 0 : i32
    %c0_i32_0 = arith.constant 0 : i32
    %c0_i32_1 = arith.constant 0 : i32
    return %c0_i32, %c0_i32_0 : i32, i32
  }
  func.func @transform_4(%arg0: i32) -> (i32, i32) {
    %c0_i32 = arith.constant 0 : i32
    %c0_i32_0 = arith.constant 0 : i32
    %c0_i32_1 = arith.constant 0 : i32
    return %c0_i32, %c0_i32_0 : i32, i32
  }
  func.func @transform_5(%arg0: i32) -> (i32, i32) {
    %c0_i32 = arith.constant 0 : i32
    %c0_i32_0 = arith.constant 0 : i32
    %c0_i32_1 = arith.constant 0 : i32
    return %c0_i32, %c0_i32_0 : i32, i32
  }
  func.func @transform_6(%arg0: i32) -> (i32, i32) {
    %c0_i32 = arith.constant 0 : i32
    %c0_i32_0 = arith.constant 0 : i32
    %c0_i32_1 = arith.constant 0 : i32
    return %c0_i32, %c0_i32_0 : i32, i32
  }
  func.func @transform_7(%arg0: i32) -> (i32, i32) {
    %c0_i32 = arith.constant 0 : i32
    %c0_i32_0 = arith.constant 0 : i32
    %c0_i32_1 = arith.constant 0 : i32
    return %c0_i32, %c0_i32_0 : i32, i32
  }
  func.func @transform_8(%arg0: i32) -> (i32, i32) {
    %c0_i32 = arith.constant 0 : i32
    %c0_i32_0 = arith.constant 0 : i32
    %c0_i32_1 = arith.constant 0 : i32
    return %c0_i32, %c0_i32_0 : i32, i32
  }
  func.func @transform_9(%arg0: i32) -> (i32, i32) {
    %c0_i32 = arith.constant 0 : i32
    %c0_i32_0 = arith.constant 0 : i32
    %c0_i32_1 = arith.constant 0 : i32
    return %c0_i32, %c0_i32_0 : i32, i32
  }
  func.func @transform_10(%arg0: i32) -> (i32, i32) {
    %c0_i32 = arith.constant 0 : i32
    %c0_i32_0 = arith.constant 0 : i32
    %c0_i32_1 = arith.constant 0 : i32
    return %c0_i32, %c0_i32_0 : i32, i32
  }
  func.func @transform_11(%arg0: i32) -> (i32, i32, i32) {
    %c0_i32 = arith.constant 0 : i32
    %c0_i32_0 = arith.constant 0 : i32
    %c0_i32_1 = arith.constant 0 : i32
    %c0_i32_2 = arith.constant 0 : i32
    return %c0_i32, %c0_i32_0, %c0_i32_1 : i32, i32, i32
  }
  func.func @transform_12(%arg0: i32) -> (i32, i32, i32) {
    %c0_i32 = arith.constant 0 : i32
    %c0_i32_0 = arith.constant 0 : i32
    %c0_i32_1 = arith.constant 0 : i32
    %c0_i32_2 = arith.constant 0 : i32
    return %c0_i32, %c0_i32_0, %c0_i32_1 : i32, i32, i32
  }
  func.func @transform_13(%arg0: i32) -> i32 {
    %c0_i32 = arith.constant 0 : i32
    %c0_i32_0 = arith.constant 0 : i32
    return %c0_i32 : i32
  }
  func.func @transform_14(%arg0: i32) -> (i32, i32, i32, i32) {
    %c0_i32 = arith.constant 0 : i32
    %c0_i32_0 = arith.constant 0 : i32
    %c0_i32_1 = arith.constant 0 : i32
    %c0_i32_2 = arith.constant 0 : i32
    return %arg0, %c0_i32, %c0_i32_0, %c0_i32_1 : i32, i32, i32, i32
  }
}

</mosaic_0001>

<bundles_post_ra>
// kernel: tpu_custom_call.1
= control target key start
LH: loop header
LB: loop body
LE: loop exit
PB: predicated region body
PF: predicated region fallthrough
CT: control target
= control target key end

     0   :  { %s4264_s0 = inlined_call_operand.vmem [shape: f32[2,8,8,32], index: 0, kind: input, shape index: {}]   ;;  %s4265_s1 = inlined_call_operand.hbm [shape: f32[2,8,1,32], index: 1, kind: input, shape index: {}]   ;;  %s4266_s2 = inlined_call_operand.hbm [shape: f32[2,8,8,8], index: 2, kind: input, shape index: {}]   ;;  %s4267_s3 = inlined_call_operand.hbm [shape: f32[32,32], index: 3, kind: input, shape index: {}]   ;;  %s4268_s4 = inlined_call_operand.hbm [shape: f32[32,32], index: 4, kind: input, shape index: {}]   ;;  %s4269_s5 = inlined_call_operand.hbm [shape: f32[8,32], index: 5, kind: input, shape index: {}]   ;;  %s4270_s6 = inlined_call_operand.vmem [shape: f32[1,32], index: 6, kind: input, shape index: {}]   ;;  %s4271_s7 = inlined_call_operand.vmem [shape: f32[32,2], index: 7, kind: input, shape index: {}]   ;;  %s4272_s8 = inlined_call_operand.vmem [shape: f32[1,2], index: 8, kind: input, shape index: {}]   ;;  %s4273_s9 = inlined_call_operand.vmem [shape: f32[2,32], index: 9, kind: input, shape index: {}]   ;;  %s4274_s10 = inlined_call_operand.vmem [shape: f32[1,32], index: 10, kind: input, shape index: {}]   ;;  %s4275_s11 = inlined_call_operand.vmem [shape: f32[7,16,8], index: 11, kind: input, shape index: {}]   ;;  %s4276_s12 = inlined_call_operand.vmem [shape: f32[7,8,8], index: 12, kind: input, shape index: {}]   ;;  %s4277_s13 = inlined_call_operand.<no memory space> [shape: f32[1], index: 13, kind: input, shape index: {}]   ;;  %s4278_s14 = inlined_call_operand.hbm [shape: f32[2,8,8,32], index: 14, kind: output, shape index: {}]  }
   0x1   :  { %4289 = sst [smem:[#allocation20_spill]] %s4265_s1 }
   0x2   :  { %4290 = sst [smem:[#allocation21_spill]] %s4267_s3 }
   0x3   :  { %4291 = sst [smem:[#allocation22_spill]] %s4268_s4 }
   0x4   :  { %4292 = sst [smem:[#allocation23_spill]] %s4269_s5 }
   0x5   :  { %4293 = sst [smem:[#allocation24_spill]] %s4272_s8 }
   0x6   :  { %4294 = sst [smem:[#allocation25_spill]] %s4274_s10 }
   0x7   :  { %4295 = sst [smem:[#allocation26_spill]] %s4275_s11 }
   0x8   :  { %4296 = sst [smem:[#allocation27_spill]] %s4276_s12 }
   0x9   :  { %4297 = sst [smem:[#allocation28_spill]] %s4278_s14 }
   0xa   :  { %19 = sst [smem:[#allocation2]] %s4277_s13 }
   0xb   :  { %20 = vsyncpa [#allocation4], 0 }
   0xc   :  { %22 = vsyncpa [#allocation4 + $0x1], 0 }
   0xd   :  { %23 = vsyncpa [#allocation7], 0 }
   0xe   :  { %25 = vsyncpa [#allocation7 + $0x1], 0 }
   0xf   :  { %26 = vsyncpa [#allocation10], 0 }
  0x10   :  { %27 = vsyncpa [#allocation5], 0 }
  0x11   :  { %29 = vsyncpa [#allocation5 + $0x1], 0  ;;  %s3569_s15 = smov 0   ;;  %s3571_s16 = smov 0  }
  0x12   :  { %s3573_s17 = smov 0   ;;  %s3575_s18 = smov 0  }
  0x13 LB: > { %4298 = sst [smem:[#allocation18_spill]] %s3461_s15  ;;  %s3590_s13 = sadd.s32 4294967295, %s3473_s18   ;;  %s3473_s18 = sphi %s3575_s18, %s4332_s18   ;;  %s3469_s17 = sphi %s3573_s17, %s4331_s17   ;;  %s3465_s16 = sphi %s3571_s16, %s4330_s16   ;;  %s3461_s15 = sphi %s3569_s15, %s4329_s15  }
  0x14   : > { %s2802_s19 = sadd.s32 4294967294, %s3473_s18   ;;  %p81_p0 = scmp.ne.s32.totalorder %s3465_s16, %s3461_s15 }
  0x15   : > { %p4282_p1 = scmp.eq.s32.totalorder %s3590_s13, 0  ;;  %p368_p3 = scmp.eq.s32.totalorder %s2802_s19, 1 }
  0x16   : > { %p2803_p5 = scmp.ge.s32.totalorder %s3473_s18, 1  ;;  %p375_p7 = scmp.lt.s32.totalorder %s3473_s18, 3 }
  0x17   : > { %p3599_p4 = por %p4282_p1, %p81_p0  ;;  %p3604_p6 = por %p368_p3, %p81_p0 }
  0x18   : > { %p3609_p8 = pnand %p2803_p5, %p375_p7  ;;  %s3475_s23 = smov [#allocation8]  }
  0x19   : > { %s4299_s20 = scalar_select %p3599_p4, 1, 0 }
  0x1a   : > { %s4300_s21 = scalar_select %p3604_p6, 1, 0 }
  0x1b   : > { %s4302_s22 = scalar_select %p3609_p8, 1, 0 }
  0x1c   : > { %4301 = sst [smem:[#allocation19_spill]] %s4300_s21  ;;  %s387_s24 = sshll.u32 %s3475_s23, 4  ;;  %s3613_s24 = int_to_ptr.vmem [resolvable:$true] %s387_s24 }
  0x1d   : > { %p3169_p9 = pneg %p3609_p8  ;;  %s3476_s26 = smov [#allocation9]  }
  0x1e   : > { %s400_s27 = sshll.u32 %s3476_s26, 4  ;;  %s3477_s28 = smov [#allocation11]   ;;  %s3624_s27 = int_to_ptr.vmem [resolvable:$true] %s400_s27 }
  0x1f   : > { %p3620_p11 = pnand %p3169_p9, %p4282_p1  ;;  %s3626_s29 = sshll.u32 %s3477_s28, 4  ;;  %s415_s29 = int_to_ptr.vmem [resolvable:$true] %s3626_s29 }
  0x20   : > { %s4304_s3 = sld [smem:[#allocation21_spill]] }
  0x21   : > { %p3636_p13 = pneg %p3620_p11 }
  0x26   : > { %s3251_s23 = scalar_lea.hbm %s4304_s3, 512 }
  0x27   : > { %p3252_p12 = scmp.ne.s32.totalorder %s4304_s3, %s3251_s23  ;;  %p3258_p5 = scmp.lt.u32.totalorder %s3251_s23, %s4304_s3 }
  0x29   : > { %p3254_p0 = pnand %p3636_p13, %p3252_p12 }
  0x2b   : > { %p3255_p3 = pneg %p3254_p0 }
  0x2d   : > { %p3260_p7 = pnand %p3258_p5, %p3255_p3 }
  0x2f   : > { %3263 = shalt.err (!%p3260_p7)
}
  0x30   : > { %s3264_s15 = scalar_lea.vmem %s3613_s24, 512  ;;  %p3272_p2 = scmp.lt.s32.totalorder %s3613_s24, %s3613_s24 }
  0x31   : > { %p3265_p9 = scmp.ne.s32.totalorder %s3613_s24, %s3264_s15  ;;  %p3273_p6 = scmp.lt.s32.totalorder %s3264_s15, %s3264_s15 }
  0x33   : > { %p3267_p10 = pnand %p3265_p9, %p3636_p13  ;;  %p3274_p12 = por %p3273_p6, %p3272_p2 }
  0x35   : > { %p3268_p1 = pneg %p3267_p10 }
  0x37   : > { %p3275_p0 = pnand %p3274_p12, %p3268_p1 }
  0x39   : > { %3278 = shalt.err (!%p3275_p0)
}
  0x3a   : > { %s4287_s21 = smov 128   ;;  %s4288_s30 = smov 8  }
  0x3b   : > { %3172 = dma.hbm_to_vmem [thread:$0]  (!%p3620_p11), %s4304_s3, 512, %s3613_s24, [#allocation7], %s4287_s21, %s4287_s21, %s4288_s30  }
  0x3c   : > { %s4306_s4 = sld [smem:[#allocation22_spill]] }
  0x42   : > { %s3279_s15 = scalar_lea.hbm %s4306_s4, 512 }
  0x43   : > { %p3280_p1 = scmp.ne.s32.totalorder %s4306_s4, %s3279_s15  ;;  %p3286_p10 = scmp.lt.u32.totalorder %s3279_s15, %s4306_s4 }
  0x45   : > { %p3282_p2 = pnand %p3280_p1, %p3636_p13 }
  0x47   : > { %p3283_p6 = pneg %p3282_p2 }
  0x49   : > { %p3288_p3 = pnand %p3286_p10, %p3283_p6 }
  0x4b   : > { %3291 = shalt.err (!%p3288_p3)
}
  0x4c   : > { %s3292_s24 = scalar_lea.vmem %s3624_s27, 512  ;;  %p3300_p12 = scmp.lt.s32.totalorder %s3624_s27, %s3624_s27 }
  0x4d   : > { %p3293_p5 = scmp.ne.s32.totalorder %s3624_s27, %s3292_s24  ;;  %p3301_p0 = scmp.lt.s32.totalorder %s3292_s24, %s3292_s24 }
  0x4f   : > { %p3295_p7 = pnand %p3293_p5, %p3636_p13  ;;  %p3302_p1 = por %p3301_p0, %p3300_p12 }
  0x51   : > { %p3296_p9 = pneg %p3295_p7 }
  0x53   : > { %p3303_p2 = pnand %p3302_p1, %p3296_p9 }
  0x55   : > { %3306 = shalt.err (!%p3303_p2)
}
  0x56   : > { %3175 = dma.hbm_to_vmem [thread:$0]  (!%p3620_p11), %s4306_s4, 512, %s3624_s27, [#allocation10], %s4287_s21, %s4287_s21, %s4288_s30  }
  0x57   : > { %s4307_s5 = sld [smem:[#allocation23_spill]] }
  0x5d   : > { %s3307_s19 = scalar_lea.hbm %s4307_s5, 128 }
  0x5e   : > { %p3308_p6 = scmp.ne.s32.totalorder %s4307_s5, %s3307_s19  ;;  %p3314_p5 = scmp.lt.u32.totalorder %s3307_s19, %s4307_s5 }
  0x60   : > { %p3310_p10 = pnand %p3308_p6, %p3636_p13 }
  0x62   : > { %p3311_p3 = pneg %p3310_p10 }
  0x64   : > { %p3316_p7 = pnand %p3314_p5, %p3311_p3 }
  0x66   : > { %3319 = shalt.err (!%p3316_p7)
}
  0x67   : > { %s3320_s24 = scalar_lea.vmem %s415_s29, 128  ;;  %p3328_p1 = scmp.lt.s32.totalorder %s415_s29, %s415_s29 }
  0x68   : > { %p3321_p9 = scmp.ne.s32.totalorder %s415_s29, %s3320_s24  ;;  %p3329_p2 = scmp.lt.s32.totalorder %s3320_s24, %s3320_s24 }
  0x6a   : > { %p3323_p12 = pnand %p3321_p9, %p3636_p13  ;;  %p3330_p4 = por %p3329_p2, %p3328_p1 }
  0x6c   : > { %p3324_p0 = pneg %p3323_p12 }
  0x6e   : > { %p3331_p8 = pnand %p3330_p4, %p3324_p0 }
  0x70   : > { %3334 = shalt.err (!%p3331_p8)
}
  0x71   : > { %3178 = dma.hbm_to_vmem [thread:$0]  (!%p3620_p11), %s4307_s5, 128, %s415_s29, [#allocation10]  }
  0x72   : > { %s3706_s14 = sadd.s32 1, %s3473_s18   ;;  %s68_s25 = sadd.s32 1, %s3469_s17 }
  0x73   : > { %s65_s10 = ssub.s32 %s3473_s18, %s3706_s14  ;;  %p75_p8 = scmp.ne.s32.totalorder %s3469_s17, %s3465_s16 }
  0x74   : > { %p66_p4 = scmp.eq.s32.totalorder %s65_s10, 0  ;;  %p76_p13 = scmp.eq.s32.totalorder %s3473_s18, 0 }
  0x75   : > { %p3193_p6 = scmp.lt.s32.totalorder %s3473_s18, 2  ;;  %p4308_p3 = scmp.eq.s32.totalorder %s3590_s13, 1 }
  0x76   : > { %s3716_s11 = scalar_select %p66_p4, %s3469_s17, %s68_s25  }
  0x77   : > { %p77_p10 = por %p76_p13, %p75_p8  ;;  %p3720_p5 = por %p4308_p3, %p75_p8 }
  0x78   : > { %s3725_s19 = sand.u32 1, %s3469_s17   ;;  %s2885_s29 = sshll.u32 %s3473_s18, 7 }
  0x79   : > { %s2808_s23 = sshll.u32 %s3725_s19, 3  ;;  %s4310_s1 = sld [smem:[#allocation20_spill]] }
  0x7a   : > { %s461_s24 = scalar_lea.vmem [#allocation3], %s2808_s23  ;;  %p3734_p11 = pnand %p3193_p6, %p77_p10 }
  0x7b   : > { %s468_s27 = sshll.u32 %s461_s24, 4  ;;  %s458_s10 = scalar_lea.sflag [#allocation4], %s3725_s19  ;;  %s3738_s27 = int_to_ptr.vmem [resolvable:$true] %s468_s27 }
  0x7c   : > { %p3337_p9 = pneg %p3734_p11 }
  0x7f   : > { %s3732_s15 = scalar_lea.hbm %s4310_s1, %s2885_s29  ;;  %s3340_s26 = scalar_lea.hbm %s4310_s1, 256 }
  0x80   : > { %s3335_s25 = scalar_lea.hbm %s3732_s15, 128  ;;  %p3341_p1 = scmp.lt.u32.totalorder %s3732_s15, %s4310_s1 }
  0x81   : > { %p3336_p7 = scmp.ne.s32.totalorder %s3732_s15, %s3335_s25  ;;  %p3342_p2 = scmp.lt.u32.totalorder %s3340_s26, %s3335_s25 }
  0x82   : > { %p3344_p8 = scmp.lt.u32.totalorder %s3335_s25, %s3732_s15 }
  0x83   : > { %p3338_p12 = pnand %p3337_p9, %p3336_p7  ;;  %p3343_p4 = por %p3342_p2, %p3341_p1 }
  0x85   : > { %p3339_p0 = pneg %p3338_p12  ;;  %p3345_p13 = por %p3344_p8, %p3343_p4 }
  0x87   : > { %p3346_p6 = pnand %p3345_p13, %p3339_p0 }
  0x89   : > { %3349 = shalt.err (!%p3346_p6)
}
  0x8a   : > { %s3350_s21 = scalar_lea.vmem %s3738_s27, 128  ;;  %s3480_s29 = smov [#allocation3]  }
  0x8b   : > { %p3351_p10 = scmp.ne.s32.totalorder %s3738_s27, %s3350_s21  ;;  %s3355_s23 = sshll.u32 %s3480_s29, 4  ;;  %s3356_s23 = int_to_ptr.vmem [resolvable:$false] %s3355_s23 }
  0x8c   : > { %s3357_s28 = scalar_lea.vmem %s3356_s23, 256  ;;  %p3358_p12 = scmp.lt.s32.totalorder %s3738_s27, %s3356_s23 }
  0x8d   : > { %p3353_p3 = pnand %p3351_p10, %p3337_p9  ;;  %p3359_p1 = scmp.lt.s32.totalorder %s3357_s28, %s3350_s21 }
  0x8f   : > { %p3354_p7 = pneg %p3353_p3  ;;  %p3360_p2 = por %p3359_p1, %p3358_p12 }
  0x91   : > { %p3361_p4 = pnand %p3360_p2, %p3354_p7 }
  0x93   : > { %3364 = shalt.err (!%p3361_p4)
}
  0x94   : > { %s3481_s25 = smov 16   ;;  %s3482_s26 = smov 1  }
  0x95   : > { %3182 = dma.hbm_to_vmem [thread:$0]  (!%p3734_p11), %s3732_s15, 128, %s3738_s27, %s458_s10, %s3481_s25, %s3481_s25, %s3482_s26  }
  0x96   : > { %s478_s24 = sand.u32 1, %s3473_s18   ;;  %s2811_s29 = sshll.u32 %s3725_s19, 6 }
  0x97   : > { %s2886_s23 = sshll.u32 %s3473_s18, 10  ;;  %s482_s21 = scalar_lea.vmem [#allocation6], %s2811_s29 }
  0x98   : > { %s489_s28 = sshll.u32 %s482_s21, 4  ;;  %s3774_s3 = scalar_lea.hbm %s4266_s2, %s2886_s23  ;;  %s3776_s28 = int_to_ptr.vmem [resolvable:$true] %s489_s28 }
  0x99   : > { %s3778_s4 = scalar_lea.sflag [#allocation7], %s478_s24  ;;  %s3365_s5 = scalar_lea.hbm %s3774_s3, 1024 }
  0x9a   : > { %p3366_p0 = scmp.ne.s32.totalorder %s3774_s3, %s3365_s5  ;;  %s3370_s1 = scalar_lea.hbm %s4266_s2, 2048 }
  0x9b   : > { %p3371_p6 = scmp.lt.u32.totalorder %s3774_s3, %s4266_s2  ;;  %p3372_p10 = scmp.lt.u32.totalorder %s3370_s1, %s3365_s5 }
  0x9c   : > { %p3368_p8 = pnand %p3366_p0, %p3337_p9  ;;  %p3374_p7 = scmp.lt.u32.totalorder %s3365_s5, %s3774_s3 }
  0x9d   : > { %p3373_p3 = por %p3372_p10, %p3371_p6 }
  0x9e   : > { %p3369_p13 = pneg %p3368_p8 }
  0x9f   : > { %p3375_p12 = por %p3374_p7, %p3373_p3 }
  0xa1   : > { %p3376_p1 = pnand %p3375_p12, %p3369_p13 }
  0xa3   : > { %3379 = shalt.err (!%p3376_p1)
}
  0xa4   : > { %s3380_s10 = scalar_lea.vmem %s3776_s28, 1024  ;;  %s3483_s25 = smov [#allocation6]  }
  0xa5   : > { %p3381_p2 = scmp.ne.s32.totalorder %s3776_s28, %s3380_s10  ;;  %s3385_s26 = sshll.u32 %s3483_s25, 4  ;;  %s3386_s26 = int_to_ptr.vmem [resolvable:$false] %s3385_s26 }
  0xa6   : > { %s3387_s24 = scalar_lea.vmem %s3386_s26, 2048  ;;  %p3388_p8 = scmp.lt.s32.totalorder %s3776_s28, %s3386_s26 }
  0xa7   : > { %p3383_p4 = pnand %p3381_p2, %p3337_p9  ;;  %p3389_p6 = scmp.lt.s32.totalorder %s3387_s24, %s3380_s10 }
  0xa9   : > { %p3384_p0 = pneg %p3383_p4  ;;  %p3390_p10 = por %p3389_p6, %p3388_p8 }
  0xab   : > { %p3391_p3 = pnand %p3390_p10, %p3384_p0 }
  0xad   : > { %3394 = shalt.err (!%p3391_p3)
}
  0xae   : > { %s4312_s5 = smov 8   ;;  %s4313_s29 = smov 128  }
  0xaf   : > { %3185 = dma.hbm_to_vmem [thread:$0]  (!%p3734_p11), %s3774_s3, 1024, %s3776_s28, %s3778_s4, %s4313_s29, %s4313_s29, %s4312_s5  }
  0xb0   : > { %p4314_p9 = scmp.ne.s32.totalorder %s4302_s22, 0 }
  0xb1   : > { %s3810_s23 = sand.u32 (!%p4314_p9), 1, %s3465_s16   ;;  %p4315_p13 = scmp.ne.s32.totalorder (!%p4314_p9), %s4299_s20, 0 }
  0xb2   : > { %501 = sbr.rel (%p4314_p9) target bundleno = 1956 (0x7a4), region = 76  ;;  %s2815_s21 = sshll.u32 (!%p4314_p9), %s3810_s23, 3 }
  0xb3   : > { %s504_s19 = scalar_lea.sflag (!%p4314_p9), [#allocation4], %s3810_s23  ;;  %s3814_s15 = scalar_lea.vmem (!%p4314_p9), [#allocation3], %s2815_s21 }
  0xb9   : > { %3440 = dma.done.wait (%p4315_p13), %s504_s19, 128  }
  0xba   : > { %3442 = vsyncadd (%p4315_p13), %s504_s19, 4294967168  ;;  %s512_s3 = sand.u32 1, %s3590_s13   ;;  %s2816_s4 = sshll.u32 %s3810_s23, 6 }
  0xbb   : > { %s513_s22 = scalar_lea.sflag [#allocation7], %s512_s3  ;;  %s3824_s8 = scalar_lea.vmem [#allocation6], %s2816_s4 }
  0xbc   : > { %3444 = dma.done.wait (%p4315_p13), %s513_s22, 1024  }
  0xbd   : > { %3446 = vsyncadd (%p4315_p13), %s513_s22, 4294966272  ;;  %p4316_p11 = scmp.eq.s32.totalorder %s3590_s13, 0 }
  0xbf   : > { %3448 = dma.done.wait (%p4316_p11), [#allocation7], 512   ;;  %p4317_p7 = pmov %p4316_p11 }
  0xc1   : > { %3450 = vsyncadd (%p4317_p7), [#allocation7], 4294966784  ;;  %p4318_p12 = pmov %p4317_p7 }
  0xc2   : > { %p4319_p1 = pmov %p4317_p7 }
  0xc3   : > { %3452 = dma.done.wait (%p4318_p12), [#allocation10], 640  }
  0xc4   : > { %3454 = vsyncadd (%p4319_p1), [#allocation10], 4294966656  ;;  %v3484_v0 = vmov 0.0|0.0   ;;  %vm3485_vm0 = vmmov 0   ;;  %v3486_v1 = vmov 0.0   ;;  %v911_v4 = vlaneseq  ;;  %p583_p2 = scmp.lt.s32.totalorder %s3590_s13, 1 }
  0xc5   : > { %3110 = vmatprep.subr.bf16.mxu1 %v3484_v0  ;;  %2999 = vmatprep.mubr.msk.f32.mxu1 %vm3485_vm0, %v3486_v1  ;;  %v3487_v2 = vmov 1966171168   ;;  %vm617_vm1 = vcmask 64512   ;;  %v616_v5 = vld [vmem:[#allocation11] sm:$0xff]  ;;  %v597_v7 = vld [vmem:[%s3824_s8 + $0x8] sm:$0xff]  ;;  %v598_v12 = vld [vmem:[%s3824_s8 + $0x10] sm:$0xff] }
  0xc6   : > { %v909_v3 = vunpack.c.l.s4 %v3487_v2  ;;  %v596_v6 = vld [vmem:[%s3824_s8] sm:$0xff]  ;;  %v3845_v9 = vshrl.u32 %v911_v4, 7  ;;  %2957 = vmatprep.subr.mxu0 %v616_v5  ;;  %v613_v11 = vld [vmem:[#allocation8 + $0x8] sm:$0xff]  ;;  %v599_v17 = vld [vmem:[%s3824_s8 + $0x18] sm:$0xff]  ;;  %s3854_s20 = scalar_select %p583_p2, %s3590_s13, 1  ;;  %vm747_vm2 = vcmask 261120  }
  0xc7   : > { %2959 = vmatprep.mubr.msk.f32.mxu0 %vm617_vm1, %v596_v6  ;;  %v612_v10 = vld [vmem:[#allocation8] sm:$0xff]  ;;  %2958 = vmatpush3.msra.mxu0 %v616_v5  ;;  %v893_v15 = vld [vmem:[#allocation9 + $0x8] sm:$0xff]  ;;  %v894_v18 = vld [vmem:[#allocation9 + $0x10] sm:$0xff]  ;;  %vm1268_vm4 = vcmask 1041408   ;;  %s4320_s1 = sld [smem:[#allocation24_spill]]  ;;  %vm1264_vm5 = vcmask 15360  }
  0xc8   : > { %v910_v8 = vunpack.c.0.s8 %v909_v3  ;;  %v3102_v13 = vpack.c.bf16 %v613_v11, %v612_v10  ;;  %v892_v14 = vld [vmem:[#allocation9] sm:$0xff]  ;;  %2960 = vmatmul.mubr.msk.f32.vlgmr.msra.gmra.mrb[0].mxu0 %vm617_vm1, %v597_v7  ;;  %v895_v19 = vld [vmem:[#allocation9 + $0x18] sm:$0xff]  ;;  %v614_v21 = vld [vmem:[#allocation8 + $0x10] sm:$0xff]  ;;  %s2887_s28 = sshll.u32 %s3854_s20, 6  ;;  %v3922_v10 = vsub.s32 0, %v3845_v9  ;;  %vm1169_vm3 = vcmp.eq.s32.totalorder %v3845_v9, 0 }
  0xc9   : > { %v3111_v16 = vpack.c.bf16 %v893_v15, %v892_v14  ;;  %2962 = vmatprep.mubr.msk.f32.mxu0 %vm617_vm1, %v598_v12  ;;  %v600_v20 = vld [vmem:[%s3824_s8 + $0x20] sm:$0xff]  ;;  %v615_v22 = vld [vmem:[#allocation8 + $0x18] sm:$0xff]  ;;  %v3114_v24 = vpack.c.bf16 %v895_v19, %v894_v18  ;;  %v601_v37 = vld [vmem:[%s3824_s8 + $0x28] sm:$0xff]  ;;  %s587_s27 = scalar_lea.vmem %s4264_s0, %s2887_s28  ;;  %s4321_s10 = sld [smem:[#allocation25_spill]]  ;;  %vm1342_vm6 = vcmask 254976   ;;  %vm1463_vm7 = vcmask 1041409  }
  0xca   : > { %3103 = vmatprep.subr.bf16.mxu0 %v3102_v13  ;;  %v3859_v23 = vsub.s32 %v910_v8, %v3845_v9  ;;  %v3106_v25 = vpack.c.bf16 %v615_v22, %v614_v21  ;;  %v604_v26 = vld [vmem:[%s3814_s15] sm:$0x1]  ;;  %v605_v27 = vld [vmem:[%s3814_s15 + $0x1] sm:$0x1]  ;;  %v606_v28 = vld [vmem:[%s3814_s15 + $0x2] sm:$0x1] }
  0xcb   : > { %3105 = vmatpush3.bf16.msra.mxu0 %v3102_v13  ;;  %3112 = vmatpush3.bf16.msra.mxu1 %v3111_v16  ;;  %v607_v29 = vld [vmem:[%s3814_s15 + $0x3] sm:$0x1]  ;;  %v608_v30 = vld [vmem:[%s3814_s15 + $0x4] sm:$0x1]  ;;  %v609_v31 = vld [vmem:[%s3814_s15 + $0x5] sm:$0x1]  ;;  %v904_v32 = vcombine.low %v604_v26, %v605_v27 }
  0xcc   : > { %3113 = vmatprep.subr.bf16.mxu1 %v3484_v0  ;;  %2963 = vmatmul.mubr.msk.f32.gmra.mrb[2].mxu0 %vm617_vm1, %v599_v17  ;;  %v610_v33 = vld [vmem:[%s3814_s15 + $0x6] sm:$0x1]  ;;  %v611_v34 = vld [vmem:[%s3814_s15 + $0x7] sm:$0x1]  ;;  %v905_v35 = vcombine.low %v606_v28, %v607_v29  ;;  %v906_v36 = vcombine.low %v608_v30, %v609_v31  ;;  %v590_v52 = vld [vmem:[%s587_s27 + $0x10] sm:$0xff]  ;;  %s4322_s24 = sld [smem:[#allocation26_spill]] }
  0xcd   : > { %3107 = vmatprep.subr.bf16.mxu0 %v3106_v25  ;;  %2965 = vmatprep.mubr.msk.f32.mxu0 %vm617_vm1, %v600_v20  ;;  %v907_v38 = vcombine.low %v610_v33, %v611_v34  ;;  %v914_v39 = vrot.slane %v904_v32, %v3859_v23  ;;  %v602_v42 = vld [vmem:[%s3824_s8 + $0x30] sm:$0xff]  ;;  %v603_v46 = vld [vmem:[%s3824_s8 + $0x38] sm:$0xff]  ;;  %v591_v53 = vld [vmem:[%s587_s27 + $0x18] sm:$0xff]  ;;  %vm1465_vm8 = vcmask 1042434   ;;  %vm1467_vm9 = vcmask 1043459   ;;  %s4323_s20 = sld [smem:[#allocation27_spill]] }
  0xce   : > { %v921_v40 = vrot.slane %v905_v35, %v3859_v23  ;;  %v928_v41 = vrot.slane %v906_v36, %v3859_v23  ;;  %v588_v48 = vld [vmem:[%s587_s27] sm:$0xff]  ;;  %v589_v51 = vld [vmem:[%s587_s27 + $0x8] sm:$0xff]  ;;  %v594_v56 = vld [vmem:[%s587_s27 + $0x30] sm:$0xff]  ;;  %vm1469_vm10 = vcmask 1044484   ;;  %vm1471_vm11 = vcmask 1045509   ;;  %s2571_s30 = sld [smem:[#allocation2]] }
  0xcf   : > { %3115 = vmatpush3.bf16.msra.mxu1 %v3114_v24  ;;  %3109 = vmatpush3.bf16.msra.mxu0 %v3106_v25  ;;  %v935_v43 = vrot.slane %v907_v38, %v3859_v23  ;;  %v592_v54 = vld [vmem:[%s587_s27 + $0x20] sm:$0xff]  ;;  %v593_v55 = vld [vmem:[%s587_s27 + $0x28] sm:$0xff]  ;;  %v595_v57 = vld [vmem:[%s587_s27 + $0x38] sm:$0xff]  ;;  %vm1473_vm12 = vcmask 1046534   ;;  %vm1475_vm13 = vcmask 1047559   ;;  %vm1530_vm14 = vcmask 130048  }
  0xd0   : > { %3116 = vmatprep.subr.bf16.mxu1 %v3484_v0  ;;  %3037 = vmatprep.subr.mxu0 %v3486_v1  ;;  %v936_v44 = vcombine.low %v914_v39, %v921_v40  ;;  %v1171_v58 = vld [vmem:[%s4271_s7] sm:$0xff]  ;;  %v1172_v59 = vld [vmem:[%s4271_s7 + $0x8] sm:$0xff]  ;;  %v1173_v60 = vld [vmem:[%s4271_s7 + $0x10] sm:$0xff]  ;;  %s582_s27 = scalar_lea.vmem [#allocation12], %s2816_s4  ;;  %s2888_s4 = sshll.u32 %s3590_s13, 10 }
  0xd1   : > { %2966 = vmatmul.mubr.msk.f32.gmra.mrb[4].mxu0 %vm617_vm1, %v601_v37  ;;  %v937_v45 = vcombine.low %v928_v41, %v935_v43  ;;  %v3117_v61 = vpack.c.bf16 %v1172_v59, %v1171_v58  ;;  %v1174_v62 = vld [vmem:[%s4271_s7 + $0x18] sm:$0xff]  ;;  %v2839_v8 = vld [vmem:[%s4270_s6] ss:$0 sm:$0xff]  ;;  %s4324_s5 = sld [smem:[#allocation28_spill]]  ;;  %s2653_s21 = scalar_lea.sflag [#allocation5], %s3810_s23 }
  0xd2   : > { %2968 = vmatprep.mubr.msk.f32.mxu0 %vm617_vm1, %v602_v42  ;;  %v944_v47 = vrot.slane %v936_v44, %v3859_v23  ;;  %v3120_v63 = vpack.c.bf16 %v1174_v62, %v1173_v60  ;;  %s3488_s19 = smov [#allocation12]  }
  0xd3   : > { %v951_v49 = vrot.slane %v937_v45, %v3859_v23  ;;  %s3399_s15 = sshll.u32 %s3488_s19, 4  ;;  %s3400_s15 = int_to_ptr.vmem [resolvable:$false] %s3399_s15 }
  0xd4   : > { %s3401_s3 = scalar_lea.vmem %s3400_s15, 2048 }
  0xd5   : > { %2969 = vmatmul.mubr.msk.f32.gmra.mrb[6].mxu0 %vm617_vm1, %v603_v46  ;;  %v952_v50 = vcombine.low %v944_v47, %v951_v49 }
  0xd6   : > { %2979 = vmatprep.mubr.msk.f32.mxu0 %vm747_vm2, %v588_v48 }
  0xd7   : > { %3000 = vmatmul.mubr.msk.f32.vlgmr.msra.gmra.mrb[0].mxu1 %vm747_vm2, %v952_v50  ;;  %s4216_s29 = scalar_lea.hbm %s4324_s5, %s2888_s4 }
  0xd8   : > { %3010 = vmatprep.mubr.msk.f32.mxu1 %vm3485_vm0, %v3486_v1  ;;  %3118 = vmatpush3.bf16.msra.mxu1 %v3117_v61 }
  0xd9   : > { %2980 = vmatmul.mubr.msk.f32.vlgmr.msra.gmra.mrb[0].mxu0 %vm747_vm2, %v589_v51  ;;  %3119 = vmatprep.subr.bf16.mxu1 %v3484_v0 }
  0xda   : > { %2982 = vmatprep.mubr.msk.f32.mxu0 %vm747_vm2, %v590_v52 }
  0xdc   : > { %3121 = vmatpush3.bf16.msra.mxu1 %v3120_v63 }
  0xdd   : > { %2983 = vmatmul.mubr.msk.f32.gmra.mrb[2].mxu0 %vm747_vm2, %v591_v53  ;;  %3013 = vmatprep.subr.mxu1 %v3486_v1 }
  0xde   : > { %2985 = vmatprep.mubr.msk.f32.mxu0 %vm747_vm2, %v592_v54 }
  0xe1   : > { %2986 = vmatmul.mubr.msk.f32.gmra.mrb[4].mxu0 %vm747_vm2, %v593_v55 }
  0xe2   : > { %2988 = vmatprep.mubr.msk.f32.mxu0 %vm747_vm2, %v594_v56 }
  0xe5   : > { %2989 = vmatmul.mubr.msk.f32.gmra.mrb[6].mxu0 %vm747_vm2, %v595_v57 }
  0xe6   : > { %3039 = vmatprep.mubr.msk.f32.mxu0 %vm3485_vm0, %v3486_v1 }
 0x1aa   : > { %v1021_v2 = vpop.f32.mrb[0].mxu1 }
 0x1ab   : > { %v1026_v3 = vcombine.high %v1021_v2, %v1021_v2  ;;  %v1033_v5 = vrot.slane %v1021_v2, %v3859_v23  ;;  %v3001_v6 = vpop.f32.mrb[1].mxu1 }
 0x1ac   : > { %v2981_v7 = vpop.f32.mrb[0].mxu0 }
 0x1ad   : > { %v838_v11 = vpop.f32.mrb[1].mxu0  ;;  %v1040_v12 = vrot.slane %v1026_v3, %v3859_v23  ;;  %v1041_v13 = vcombine.high %v1033_v5, %v1033_v5  ;;  %v1049_v14 = vrot.slane %v1033_v5, %v3859_v23  ;;  %v885_v19 = vadd.f32 %v2981_v7, %v2839_v8 }
 0x1ae   : > { %v884_v15 = vadd.f32 %v2839_v8, %v838_v11 }
 0x1af   : > { %v1042_v16 = vcombine.high %v1040_v12, %v1040_v12  ;;  %v1063_v17 = vrot.slane %v1041_v13, %v3859_v23  ;;  %v1071_v18 = vcombine.high %v1049_v14, %v1049_v14  ;;  %v1056_v21 = vrot.slane %v1040_v12, %v3859_v23 }
 0x1b0   : > { %v2984_v20 = vpop.f32.mrb[2].mxu0  ;;  %v1078_v22 = vrot.slane %v1049_v14, %v3922_v10 }
 0x1b1   : > { %v887_v24 = vadd.f32 %v2984_v20, %v2839_v8  ;;  %v848_v25 = vpop.f32.mrb[3].mxu0  ;;  %v1082_v26 = vrot.slane %v1063_v17, %v3922_v10  ;;  %v1073_v27 = vcombine.high %v1063_v17, %v1063_v17  ;;  %v1086_v29 = vrot.slane %v1071_v18, %v3922_v10 }
 0x1b2   : > { %v886_v28 = vadd.f32 %v2839_v8, %v848_v25  ;;  %v3931_v30 = vadd.f32 %v1078_v22, %v884_v15  ;;  %v1070_v31 = vrot.slane %v1042_v16, %v3859_v23  ;;  %v1072_v42 = vcombine.high %v1056_v21, %v1056_v21 }
 0x1b3   : > { %v3934_v32 = vadd.f32 %v1082_v26, %v885_v19  ;;  %v1090_v33 = vrot.slane %v1073_v27, %v3922_v10  ;;  %v1094_v46 = vrot.slane %v1056_v21, %v3922_v10 }
 0x1b4   : > { %v3937_v34 = vadd.f32 %v1086_v29, %v886_v28  ;;  %v2987_v35 = vpop.f32.mrb[4].mxu0  ;;  %v1123_v36 = vsel %vm747_vm2, %v3931_v30, 0.0  ;;  %v1098_v38 = vrot.slane %v1070_v31, %v3922_v10  ;;  %v1074_v48 = vcombine.high %v1070_v31, %v1070_v31 }
 0x1b5   : > { %v889_v37 = vadd.f32 %v2987_v35, %v2839_v8  ;;  %v858_v39 = vpop.f32.mrb[5].mxu0  ;;  %v1124_v40 = vsel %vm747_vm2, %v3934_v32, 0.0  ;;  %v3944_v41 = vadd.f32 %v1090_v33, %v887_v24  ;;  %v1102_v56 = vrot.slane %v1072_v42, %v3922_v10  ;;  %v1256_v42 = vld [vmem:[%s4273_s9] sm:$0x3] }
 0x1b6   : > { %v1126_v23 = vsel %vm747_vm2, %v3937_v34, 0.0  ;;  %v1125_v43 = vadd.f32 %v1124_v40, %v1123_v36  ;;  %v888_v45 = vadd.f32 %v2839_v8, %v858_v39  ;;  %v1106_v54 = vrot.slane %v1074_v48, %v3922_v10 }
 0x1b7   : > { %v3948_v44 = vadd.f32 %v1098_v38, %v889_v37  ;;  %v1128_v49 = vsel %vm747_vm2, %v3944_v41, 0.0  ;;  %v1146_v61 = vsel %vm747_vm2, %v3931_v30, -inf  ;;  %v1147_v2 = vsel %vm747_vm2, %v3934_v32, -inf }
 0x1b8   : > { %v2990_v47 = vpop.f32.mrb[6].mxu0  ;;  %v1127_v50 = vadd.f32 %v1126_v23, %v1125_v43  ;;  %v3953_v51 = vadd.f32 %v1094_v46, %v888_v45  ;;  %v1149_v3 = vsel %vm747_vm2, %v3944_v41, -inf  ;;  %v1148_v13 = vsel %vm747_vm2, %v3937_v34, -inf  ;;  %v2841_v43 = vld [vmem:[%s4320_s1] ss:$0 sm:$0xff] }
 0x1b9   : > { %v868_v52 = vpop.f32.mrb[7].mxu0  ;;  %v891_v53 = vadd.f32 %v2990_v47, %v2839_v8  ;;  %v1152_v57 = vsel %vm747_vm2, %v3948_v44, -inf  ;;  %v1132_v5 = vsel %vm747_vm2, %v3948_v44, 0.0 }
 0x1ba   : > { %v890_v55 = vadd.f32 %v2839_v8, %v868_v52  ;;  %v1129_v58 = vadd.f32 %v1128_v49, %v1127_v50  ;;  %v1130_v59 = vsel %vm747_vm2, %v3953_v51, 0.0  ;;  %v1150_v60 = vsel %vm747_vm2, %v3953_v51, -inf  ;;  %v2843_v49 = vld [vmem:[%s4321_s10] ss:$0 sm:$0xff]  ;;  %s2666_s10 = sshll.u32 %s582_s27, 4  ;;  %s4218_s10 = int_to_ptr.vmem [resolvable:$true] %s2666_s10 }
 0x1bb   : > { %v3965_v62 = vadd.f32 %v1106_v54, %v891_v53  ;;  %v1153_v7 = vmax.f32 %v1147_v2, %v1152_v57  ;;  %v1151_v8 = vmax.f32 %v1146_v61, %v1150_v60  ;;  %s3395_s13 = scalar_lea.vmem %s4218_s10, 1024  ;;  %p3402_p6 = scmp.lt.s32.totalorder %s4218_s10, %s3400_s15 }
 0x1bc   : > { %v3967_v63 = vadd.f32 %v1102_v56, %v890_v55  ;;  %v1131_v6 = vadd.f32 %v1130_v59, %v1129_v58  ;;  %p3396_p4 = scmp.ne.s32.totalorder %s4218_s10, %s3395_s13  ;;  %p3403_p10 = scmp.lt.s32.totalorder %s3401_s3, %s3395_s13 }
 0x1bd   : > { %v1156_v11 = vsel %vm747_vm2, %v3965_v62, -inf  ;;  %v1158_v19 = vmax.f32 %v1151_v8, %v1153_v7  ;;  %v1136_v20 = vsel %vm747_vm2, %v3965_v62, 0.0 }
 0x1be   : > { %v1134_v12 = vsel %vm747_vm2, %v3967_v63, 0.0  ;;  %v1157_v14 = vmax.f32 %v1149_v3, %v1156_v11  ;;  %v1133_v15 = vadd.f32 %v1132_v5, %v1131_v6  ;;  %v1154_v16 = vsel %vm747_vm2, %v3967_v63, -inf  ;;  %p3397_p0 = pnand %p3396_p4, %p3720_p5  ;;  %p3404_p3 = por %p3403_p10, %p3402_p6 }
 0x1bf   : > { %v1155_v17 = vmax.f32 %v1148_v13, %v1154_v16 }
 0x1c0   : > { %v1135_v18 = vadd.f32 %v1134_v12, %v1133_v15  ;;  %p3398_p8 = pneg %p3397_p0 }
 0x1c1   : > { %v1159_v21 = vmax.f32 %v1155_v17, %v1157_v14 }
 0x1c2   : > { %v1137_v22 = vadd.f32 %v1136_v20, %v1135_v18  ;;  %p3405_p9 = pnand %p3404_p3, %p3398_p8 }
 0x1c3   : > { %v1160_v24 = vmax.f32 %v1158_v19, %v1159_v21 }
 0x1c4   : > { %v1138_v25 = vrot.slane %v1137_v22, 4 }
 0x1c5   : > { %v1161_v26 = vrot.slane %v1160_v24, 4 }
 0x1c6   : > { %v1139_v27 = vadd.f32 %v1138_v25, %v1137_v22 }
 0x1c7   : > { %v1162_v28 = vmax.f32 %v1160_v24, %v1161_v26  ;;  %v1529_v26 = vld [vmem:[%s4322_s24 + $0x8] sm:$0xff] }
 0x1c8   : > { %v1140_v29 = vrot.slane %v1139_v27, 2 }
 0x1c9   : > { %v1163_v31 = vrot.slane %v1162_v28, 2 }
 0x1ca   : > { %v1141_v33 = vadd.f32 %v1140_v29, %v1139_v27 }
 0x1cb   : > { %v1164_v35 = vmax.f32 %v1162_v28, %v1163_v31 }
 0x1cc   : > { %v1142_v36 = vrot.slane %v1141_v33, 1 }
 0x1cd   : > { %v1165_v37 = vrot.slane %v1164_v35, 1 }
 0x1ce   : > { %v1143_v38 = vadd.f32 %v1142_v36, %v1141_v33 }
 0x1cf   : > { %v1166_v39 = vmax.f32 %v1164_v35, %v1165_v37  ;;  %v1430_v37 = vand.u32 127, %v911_v4 }
 0x1d0   : > { %v1145_v40 = vmul.f32 0.015625, %v1143_v38 }
 0x1d2   : > { %v1170_v23 = vsel %vm1169_vm3, %v1145_v40, %v1166_v39 }
 0x1d3   : > { %3011 = vmatmul.mubr.msk.f32.vlgmr.msra.gmra.mrb[2].mxu1 %vm747_vm2, %v1170_v23  ;;  %v1486_v23 = vadd.s32 4294967288, %v1430_v37 }
 0x1d4   : > { %3015 = vmatprep.mubr.msk.f32.mxu1 %vm3485_vm0, %v3486_v1  ;;  %3014 = vmatpush3.msk.msra.mxu1 %vm1268_vm4, %v1256_v42  ;;  %v1433_v42 = vsub.s32 %v1430_v37, %v3845_v9 }
 0x1d5   : > { %3122 = vmatprep.subr.bf16.mxu1 %v3484_v0 }
 0x2a6   : > { %v1251_v45 = vpop.f32.mrb[2].mxu1 }
 0x2a7   : > { %v1252_v46 = vadd.f32 %v2841_v43, %v1251_v45  ;;  %v3012_v47 = vpop.f32.mrb[3].mxu1 }
 0x2a9   : > { %v1255_v48 = vmax.f32 %v1252_v46, 0.0 }
 0x2ab   : > { %3016 = vmatmul.mubr.msk.f32.vlgmr.msra.gmra.mrb[4].mxu1 %vm1264_vm5, %v1255_v48  ;;  %v1489_v48 = vsub.s32 %v1486_v23, %v3845_v9  ;;  %v1604_v23 = vld [vmem:[%s4323_s20] sm:$0xff] }
 0x2ac   : > { %3022 = vmatprep.mubr.msk.f32.mxu1 %vm3485_vm0, %v3486_v1 }
 0x37e   : > { %v1338_v50 = vpop.f32.mrb[4].mxu1 }
 0x37f   : > { %v1339_v52 = vadd.f32 %v2843_v49, %v1338_v50  ;;  %v3017_v53 = vpop.f32.mrb[5].mxu1 }
 0x381   : > { %v1343_v54 = vsel %vm1342_vm6, %v1339_v52, 0.0 }
 0x382   : > { %v1344_v55 = vrot.slane %v1343_v54, 4 }
 0x384   : > { %v1345_v56 = vadd.f32 %v1344_v55, %v1343_v54 }
 0x386   : > { %v1346_v57 = vrot.slane %v1345_v56, 2 }
 0x388   : > { %v1347_v58 = vadd.f32 %v1346_v57, %v1345_v56 }
 0x38a   : > { %v1348_v59 = vrot.slane %v1347_v58, 1 }
 0x38c   : > { %v1349_v60 = vadd.f32 %v1348_v59, %v1347_v58 }
 0x38e   : > { %v2846_v61 = vmul.f32 -1.442695, %v1349_v60 }
 0x390   : > { %3243 = vpow2.f32 %v2846_v61 }
 0x39a   : > { %v3244_v2 = vpop.eup %3243 }
 0x39b   : > { %v1353_v3 = vadd.f32 1.0, %v3244_v2 }
 0x39d   : > { %3245 = vrcp.f32 %v1353_v3 }
 0x3a7   : > { %v3246_v5 = vpop.eup %3245 }
 0x3a8   : > { %v4002_v6 = vmul.f32 %v3246_v5, %v3937_v34  ;;  %v4005_v7 = vmul.f32 %v3246_v5, %v3931_v30  ;;  %v4012_v12 = vmul.f32 %v3246_v5, %v3944_v41  ;;  %v4015_v13 = vmul.f32 %v3246_v5, %v3934_v32 }
 0x3a9   : > { %v4026_v15 = vmul.f32 %v3246_v5, %v3953_v51  ;;  %v4033_v17 = vmul.f32 %v3246_v5, %v3948_v44  ;;  %v4040_v19 = vmul.f32 %v3246_v5, %v3967_v63  ;;  %v4047_v21 = vmul.f32 %v3246_v5, %v3965_v62  ;;  %v1528_v62 = vld [vmem:[%s4322_s24] sm:$0xff] }
 0x3aa   : > { %v1370_v8 = vsel %vm747_vm2, %v4002_v6, 0.0  ;;  %v1364_v11 = vsel %vm747_vm2, %v4005_v7, 0.0  ;;  %v1373_v34 = vsel %vm747_vm2, %v4012_v12, 0.0  ;;  %v1367_v30 = vsel %vm747_vm2, %v4015_v13, 0.0 }
 0x3ab   : > { %1371 = vadd.xlane.f32.xlu1 %v1370_v8  ;;  %1365 = vadd.xlane.f32.xlu0 %v1364_v11  ;;  %v1400_v14 = vsel %vm747_vm2, %v4015_v13, -inf  ;;  %v1397_v41 = vsel %vm747_vm2, %v4005_v7, -inf  ;;  %v1403_v32 = vsel %vm747_vm2, %v4002_v6, -inf  ;;  %v1376_v16 = vsel %vm747_vm2, %v4026_v15, 0.0 }
 0x3ac   : > { %v1406_v18 = vsel %vm747_vm2, %v4012_v12, -inf  ;;  %v1379_v51 = vsel %vm747_vm2, %v4033_v17, 0.0  ;;  %v1409_v20 = vsel %vm747_vm2, %v4026_v15, -inf  ;;  %v1382_v44 = vsel %vm747_vm2, %v4040_v19, 0.0 }
 0x3ad   : > { %v1412_v22 = vsel %vm747_vm2, %v4033_v17, -inf  ;;  %v1385_v63 = vsel %vm747_vm2, %v4047_v21, 0.0  ;;  %v1418_v24 = vsel %vm747_vm2, %v4047_v21, -inf  ;;  %v1415_v25 = vsel %vm747_vm2, %v4040_v19, -inf }
 0x3ae   : > { %v3123_v27 = vpack.c.bf16 %v1529_v26, %v1528_v62  ;;  %v2849_v62 = vld [vmem:[%s4322_s24 + $0x18] sm:$0xff] }
 0x3af   : > { %1374 = vadd.xlane.f32.xlu1 %v1373_v34  ;;  %1368 = vadd.xlane.f32.xlu0 %v1367_v30 }
 0x3b0   : > { %3124 = vmatpush3.bf16.msra.mxu1 %v3123_v27 }
 0x3b1   : > { %3125 = vmatprep.subr.bf16.mxu1 %v3484_v0 }
 0x3b3   : > { %1401 = vmax.xlane.f32.xlu1 %v1400_v14  ;;  %1398 = vmax.xlane.f32.xlu0 %v1397_v41 }
 0x3b7   : > { %1404 = vmax.xlane.f32.xlu1 %v1403_v32  ;;  %1377 = vadd.xlane.f32.xlu0 %v1376_v16 }
 0x3bb   : > { %1407 = vmax.xlane.f32.xlu1 %v1406_v18  ;;  %1380 = vadd.xlane.f32.xlu0 %v1379_v51 }
 0x3bf   : > { %1410 = vmax.xlane.f32.xlu1 %v1409_v20  ;;  %1383 = vadd.xlane.f32.xlu0 %v1382_v44 }
 0x3c3   : > { %1413 = vmax.xlane.f32.xlu1 %v1412_v22  ;;  %1386 = vadd.xlane.f32.xlu0 %v1385_v63 }
 0x3c7   : > { %1419 = vmax.xlane.f32.xlu1 %v1418_v24  ;;  %1416 = vmax.xlane.f32.xlu0 %v1415_v25  ;;  %v2848_v25 = vld [vmem:[%s4322_s24 + $0x10] sm:$0xff] }
 0x3c8   : > { %v3126_v37 = vpack.c.bf16 %v2849_v62, %v2848_v25 }
 0x438   : > { %v1372_v28 = vpop.xlane.xlu1 %1371  ;;  %v1366_v29 = vpop.xlane.xlu0 %1365 }
 0x439   : > { %v1389_v43 = vmul.f32 0.03125, %v1366_v29  ;;  %v1391_v49 = vmul.f32 0.03125, %v1372_v28 }
 0x43b   : > { %v1434_v50 = vrot.slane %v1389_v43, %v1433_v42  ;;  %v1442_v59 = vrot.slane %v1391_v49, %v1433_v42  ;;  %v2854_v43 = vld [vmem:[%s4322_s24 + $0x20] sm:$0xff] }
 0x43c   : > { %v1375_v31 = vpop.xlane.xlu1 %1374  ;;  %v1369_v33 = vpop.xlane.xlu0 %1368 }
 0x43d   : > { %v1390_v40 = vmul.f32 0.03125, %v1369_v33  ;;  %v1392_v54 = vmul.f32 0.03125, %v1375_v31 }
 0x43f   : > { %v1438_v47 = vrot.slane %v1390_v40, %v1433_v42  ;;  %v1446_v14 = vrot.slane %v1392_v54, %v1433_v42 }
 0x440   : > { %v1402_v35 = vpop.xlane.xlu1 %1401  ;;  %v1399_v36 = vpop.xlane.xlu0 %1398 }
 0x441   : > { %v1464_v55 = vsel %vm1463_vm7, %v1438_v47, %v1434_v50  ;;  %v1494_v56 = vrot.slane %v1402_v35, %v1489_v48  ;;  %v1490_v57 = vrot.slane %v1399_v36, %v1489_v48  ;;  %v2851_v47 = vld [vmem:[%s4323_s20 + $0x8] sm:$0xff]  ;;  %v2859_v50 = vld [vmem:[%s4322_s24 + $0x30] sm:$0xff] }
 0x442   : > { %v1466_v8 = vsel %vm1465_vm8, %v1442_v59, %v1464_v55  ;;  %v2865_v55 = vld [vmem:[%s4322_s24 + $0x48] sm:$0xff] }
 0x443   : > { %v1519_v41 = vsel %vm1463_vm7, %v1494_v56, %v1490_v57  ;;  %v1468_v20 = vsel %vm1467_vm9, %v1446_v14, %v1466_v8  ;;  %v2869_v57 = vld [vmem:[%s4322_s24 + $0x50] sm:$0xff] }
 0x444   : > { %v1405_v38 = vpop.xlane.xlu1 %1404  ;;  %v1378_v39 = vpop.xlane.xlu0 %1377 }
 0x445   : > { %v1393_v4 = vmul.f32 0.03125, %v1378_v39  ;;  %v1498_v60 = vrot.slane %v1405_v38, %v1489_v48 }
 0x447   : > { %v1450_v11 = vrot.slane %v1393_v4, %v1433_v42  ;;  %v1520_v18 = vsel %vm1465_vm8, %v1498_v60, %v1519_v41  ;;  %v2864_v4 = vld [vmem:[%s4322_s24 + $0x40] sm:$0xff] }
 0x448   : > { %v1408_v45 = vpop.xlane.xlu1 %1407  ;;  %v1381_v46 = vpop.xlane.xlu0 %1380  ;;  %v3135_v56 = vpack.c.bf16 %v2865_v55, %v2864_v4  ;;  %v2874_v60 = vld [vmem:[%s4322_s24 + $0x60] sm:$0xff]  ;;  %v2610_v4 = vsub.s32 4, %v3845_v9 }
 0x449   : > { %v1394_v58 = vmul.f32 0.03125, %v1381_v46  ;;  %v1502_v2 = vrot.slane %v1408_v45, %v1489_v48  ;;  %v1470_v26 = vsel %vm1469_vm10, %v1450_v11, %v1468_v20  ;;  %v2855_v45 = vld [vmem:[%s4322_s24 + $0x28] sm:$0xff] }
 0x44b   : > { %v1454_v32 = vrot.slane %v1394_v58, %v1433_v42  ;;  %v1521_v44 = vsel %vm1467_vm9, %v1502_v2, %v1520_v18  ;;  %v2870_v58 = vld [vmem:[%s4322_s24 + $0x58] sm:$0xff]  ;;  %v2867_v18 = vld [vmem:[%s4323_s20 + $0x20] sm:$0xff] }
 0x44c   : > { %v1411_v52 = vpop.xlane.xlu1 %1410  ;;  %v1384_v53 = vpop.xlane.xlu0 %1383  ;;  %v3138_v59 = vpack.c.bf16 %v2870_v58, %v2869_v57  ;;  %v2603_v57 = vsub.s32 3, %v3845_v9  ;;  %v2624_v58 = vsub.s32 6, %v3845_v9 }
 0x44d   : > { %v1395_v61 = vmul.f32 0.03125, %v1384_v53  ;;  %v1506_v34 = vrot.slane %v1411_v52, %v1489_v48  ;;  %v1472_v31 = vsel %vm1471_vm11, %v1454_v32, %v1470_v26  ;;  %v2860_v52 = vld [vmem:[%s4322_s24 + $0x38] sm:$0xff] }
 0x44e   : > { %v3132_v54 = vpack.c.bf16 %v2860_v52, %v2859_v50 }
 0x44f   : > { %v1458_v51 = vrot.slane %v1395_v61, %v1433_v42  ;;  %v1522_v27 = vsel %vm1469_vm10, %v1506_v34, %v1521_v44  ;;  %v2875_v61 = vld [vmem:[%s4322_s24 + $0x68] sm:$0xff] }
 0x450   : > { %v1414_v3 = vpop.xlane.xlu1 %1413  ;;  %v1387_v5 = vpop.xlane.xlu0 %1386  ;;  %v3141_v2 = vpack.c.bf16 %v2875_v61, %v2874_v60  ;;  %v2872_v44 = vld [vmem:[%s4323_s20 + $0x28] sm:$0xff]  ;;  %v2617_v61 = vsub.s32 5, %v3845_v9 }
 0x451   : > { %v1396_v30 = vmul.f32 0.03125, %v1387_v5  ;;  %v1510_v16 = vrot.slane %v1414_v3, %v1489_v48  ;;  %v1474_v35 = vsel %vm1473_vm12, %v1458_v51, %v1472_v31 }
 0x453   : > { %v1462_v22 = vrot.slane %v1396_v30, %v1433_v42  ;;  %v1523_v33 = vsel %vm1471_vm11, %v1510_v16, %v1522_v27  ;;  %v2857_v30 = vld [vmem:[%s4323_s20 + $0x10] sm:$0xff] }
 0x454   : > { %v1420_v63 = vpop.xlane.xlu1 %1419  ;;  %v1417_v24 = vpop.xlane.xlu0 %1416 }
 0x455   : > { %v1518_v28 = vrot.slane %v1420_v63, %v1489_v48  ;;  %v1514_v29 = vrot.slane %v1417_v24, %v1489_v48  ;;  %v1476_v38 = vsel %vm1475_vm13, %v1462_v22, %v1474_v35  ;;  %v3129_v48 = vpack.c.bf16 %v2855_v45, %v2854_v43  ;;  %v2877_v24 = vld [vmem:[%s4323_s20 + $0x30] sm:$0xff] }
 0x457   : > { %v1524_v36 = vsel %vm1473_vm12, %v1514_v29, %v1523_v33 }
 0x458   : > { %v1525_v39 = vsel %vm1475_vm13, %v1518_v28, %v1524_v36 }
 0x459   : > { %v1527_v40 = vsel %vm617_vm1, %v1476_v38, %v1525_v39 }
 0x45a   : > { %3023 = vmatmul.mubr.msk.f32.vlgmr.msra.gmra.mrb[6].mxu1 %vm1530_vm14, %v1527_v40 }
 0x45b   : > { %3127 = vmatpush3.bf16.msra.mxu1 %v3126_v37  ;;  %3029 = vmatprep.mubr.msk.f32.mxu1 %vm3485_vm0, %v3486_v1 }
 0x45c   : > { %3032 = vmatprep.subr.mxu1 %v3486_v1 }
 0x45e   : > { %3030 = vmatmul.mubr.msk.f32.vlgmr.msra.gmra.mrb[8].mxu1 %vm1530_vm14, %v1527_v40 }
 0x45f   : > { %3034 = vmatprep.mubr.msk.f32.mxu1 %vm3485_vm0, %v3486_v1 }
 0x52d   : > { %v1600_v42 = vpop.f32.mrb[6].mxu1 }
 0x52e   : > { %v3024_v46 = vpop.f32.mrb[7].mxu1  ;;  %3038 = vmatpush3.msra.mxu0 %v1600_v42 }
 0x52f   : > { %3040 = vmatmul.mubr.msk.f32.vlgmr.msra.gmra.mrb[8].mxu0 %vm617_vm1, %v1604_v23  ;;  %3049 = vmatprep.subr.mxu0 %v3486_v1  ;;  %v2572_v23 = vstv %s2571_s30 }
 0x530   : > { %3051 = vmatprep.mubr.msk.f32.mxu0 %vm3485_vm0, %v3486_v1 }
 0x531   : > { %v1674_v49 = vpop.f32.mrb[8].mxu1 }
 0x532   : > { %v3031_v53 = vpop.f32.mrb[9].mxu1  ;;  %3033 = vmatpush3.msra.mxu1 %v1674_v49  ;;  %v2589_v49 = vsub.s32 1, %v3845_v9 }
 0x533   : > { %3035 = vmatmul.mubr.msk.f32.vlgmr.msra.gmra.mrb[10].mxu1 %vm617_vm1, %v2851_v47  ;;  %3128 = vmatprep.subr.bf16.mxu1 %v3484_v0 }
 0x534   : > { %3130 = vmatpush3.bf16.msra.mxu1 %v3129_v48  ;;  %3046 = vmatprep.mubr.msk.f32.mxu1 %vm3485_vm0, %v3486_v1 }
 0x535   : > { %3131 = vmatprep.subr.bf16.mxu1 %v3484_v0 }
 0x537   : > { %3047 = vmatmul.mubr.msk.f32.vlgmr.msra.gmra.mrb[12].mxu1 %vm1530_vm14, %v1527_v40 }
 0x538   : > { %3133 = vmatpush3.bf16.msra.mxu1 %v3132_v54  ;;  %3058 = vmatprep.mubr.msk.f32.mxu1 %vm3485_vm0, %v3486_v1  ;;  %v2596_v54 = vsub.s32 2, %v3845_v9 }
 0x539   : > { %3134 = vmatprep.subr.bf16.mxu1 %v3484_v0 }
 0x53b   : > { %3059 = vmatmul.mubr.msk.f32.vlgmr.msra.gmra.mrb[14].mxu1 %vm1530_vm14, %v1527_v40 }
 0x53c   : > { %3136 = vmatpush3.bf16.msra.mxu1 %v3135_v56  ;;  %3070 = vmatprep.mubr.msk.f32.mxu1 %vm3485_vm0, %v3486_v1 }
 0x53d   : > { %3137 = vmatprep.subr.bf16.mxu1 %v3484_v0 }
 0x53f   : > { %3071 = vmatmul.mubr.msk.f32.vlgmr.msra.gmra.mrb[16].mxu1 %vm1530_vm14, %v1527_v40 }
 0x540   : > { %3139 = vmatpush3.bf16.msra.mxu1 %v3138_v59  ;;  %3082 = vmatprep.mubr.msk.f32.mxu1 %vm3485_vm0, %v3486_v1 }
 0x541   : > { %3140 = vmatprep.subr.bf16.mxu1 %v3484_v0  ;;  %v2862_v0 = vld [vmem:[%s4323_s20 + $0x18] sm:$0xff] }
 0x543   : > { %3083 = vmatmul.mubr.msk.f32.vlgmr.msra.gmra.mrb[18].mxu1 %vm1530_vm14, %v1527_v40 }
 0x544   : > { %3142 = vmatpush3.bf16.msra.mxu1 %v3141_v2  ;;  %3094 = vmatprep.mubr.msk.f32.mxu1 %vm3485_vm0, %v3486_v1  ;;  %v2631_v2 = vsub.s32 7, %v3845_v9 }
 0x547   : > { %3095 = vmatmul.mubr.msk.f32.vlgmr.msra.gmra.mrb[20].mxu1 %vm1530_vm14, %v1527_v40 }
 0x602   : > { %v1822_v3 = vpop.f32.mrb[8].mxu0 }
 0x603   : > { %v3041_v5 = vpop.f32.mrb[9].mxu0 }
 0x606   : > { %v1749_v8 = vpop.f32.mrb[10].mxu1 }
 0x607   : > { %v1823_v11 = vadd.f32 %v1822_v3, %v1749_v8  ;;  %v3036_v34 = vpop.f32.mrb[11].mxu1 }
 0x60a   : > { %v1895_v14 = vpop.f32.mrb[12].mxu1 }
 0x60b   : > { %v3048_v41 = vpop.f32.mrb[13].mxu1  ;;  %3050 = vmatpush3.msra.mxu0 %v1895_v14 }
 0x60c   : > { %3052 = vmatmul.mubr.msk.f32.vlgmr.msra.gmra.mrb[10].mxu0 %vm617_vm1, %v2857_v30  ;;  %3061 = vmatprep.subr.mxu0 %v3486_v1 }
 0x60d   : > { %3063 = vmatprep.mubr.msk.f32.mxu0 %vm3485_vm0, %v3486_v1 }
 0x60e   : > { %v2044_v32 = vpop.f32.mrb[14].mxu1 }
 0x60f   : > { %v3060_v16 = vpop.f32.mrb[15].mxu1  ;;  %3062 = vmatpush3.msra.mxu0 %v2044_v32 }
 0x610   : > { %3064 = vmatmul.mubr.msk.f32.vlgmr.msra.gmra.mrb[12].mxu0 %vm617_vm1, %v2862_v0  ;;  %3073 = vmatprep.subr.mxu0 %v3486_v1 }
 0x611   : > { %3075 = vmatprep.mubr.msk.f32.mxu0 %vm3485_vm0, %v3486_v1 }
 0x612   : > { %v2193_v51 = vpop.f32.mrb[16].mxu1 }
 0x613   : > { %v3072_v20 = vpop.f32.mrb[17].mxu1  ;;  %3074 = vmatpush3.msra.mxu0 %v2193_v51 }
 0x614   : > { %3076 = vmatmul.mubr.msk.f32.vlgmr.msra.gmra.mrb[14].mxu0 %vm617_vm1, %v2867_v18  ;;  %3085 = vmatprep.subr.mxu0 %v3486_v1 }
 0x615   : > { %3087 = vmatprep.mubr.msk.f32.mxu0 %vm3485_vm0, %v3486_v1 }
 0x616   : > { %v2342_v22 = vpop.f32.mrb[18].mxu1 }
 0x617   : > { %v3084_v63 = vpop.f32.mrb[19].mxu1  ;;  %3086 = vmatpush3.msra.mxu0 %v2342_v22 }
 0x618   : > { %3088 = vmatmul.mubr.msk.f32.vlgmr.msra.gmra.mrb[16].mxu0 %vm617_vm1, %v2872_v44  ;;  %3097 = vmatprep.subr.mxu0 %v3486_v1 }
 0x619   : > { %3099 = vmatprep.mubr.msk.f32.mxu0 %vm3485_vm0, %v3486_v1 }
 0x61a   : > { %v2491_v25 = vpop.f32.mrb[20].mxu1 }
 0x61b   : > { %v3096_v62 = vpop.f32.mrb[21].mxu1  ;;  %3098 = vmatpush3.msra.mxu0 %v2491_v25 }
 0x61c   : > { %3100 = vmatmul.mubr.msk.f32.vlgmr.msra.gmra.mrb[18].mxu0 %vm617_vm1, %v2877_v24 }
 0x6df   : > { %v1970_v26 = vpop.f32.mrb[10].mxu0 }
 0x6e0   : > { %v1974_v27 = vadd.f32 %v1970_v26, %v1823_v11  ;;  %v3053_v28 = vpop.f32.mrb[11].mxu0 }
 0x6e3   : > { %v2119_v29 = vpop.f32.mrb[12].mxu0 }
 0x6e4   : > { %v2123_v31 = vadd.f32 %v2119_v29, %v1974_v27  ;;  %v3065_v33 = vpop.f32.mrb[13].mxu0 }
 0x6e7   : > { %v2268_v35 = vpop.f32.mrb[14].mxu0 }
 0x6e8   : > { %v2272_v36 = vadd.f32 %v2268_v35, %v2123_v31  ;;  %v3077_v37 = vpop.f32.mrb[15].mxu0 }
 0x6eb   : > { %v2417_v1 = vpop.f32.mrb[16].mxu0 }
 0x6ec   : > { %v2421_v38 = vadd.f32 %v2417_v1, %v2272_v36  ;;  %v3089_v39 = vpop.f32.mrb[17].mxu0 }
 0x6ef   : > { %v2566_v40 = vpop.f32.mrb[18].mxu0 }
 0x6f0   : > { %v2570_v42 = vadd.f32 %v2566_v40, %v2421_v38  ;;  %v3101_v43 = vpop.f32.mrb[19].mxu0 }
 0x6f2   : > { %v2573_v45 = vadd.f32 %v2572_v23, %v2570_v42 }
 0x6f4   : > { %v2879_v46 = vmul.f32 -1.442695, %v2573_v45 }
 0x6f6   : > { %3247 = vpow2.f32 %v2879_v46 }
 0x700   : > { %v3248_v47 = vpop.eup %3247 }
 0x701   : > { %v2577_v48 = vadd.f32 1.0, %v3248_v47 }
 0x703   : > { %3249 = vrcp.f32 %v2577_v48 }
 0x70d   : > { %v3250_v50 = vpop.eup %3249 }
 0x70e   : > { %v2590_v52 = vrot.slane %v3250_v50, %v2589_v49  ;;  %v2583_v53 = vrot.slane %v3250_v50, %v3922_v10  ;;  %v2597_v55 = vrot.slane %v3250_v50, %v2596_v54  ;;  %v2611_v56 = vrot.slane %v3250_v50, %v2610_v4 }
 0x70f   : > { %v2604_v59 = vrot.slane %v3250_v50, %v2603_v57  ;;  %v2625_v60 = vrot.slane %v3250_v50, %v2624_v58  ;;  %v2618_v10 = vrot.slane %v3250_v50, %v2617_v61  ;;  %v2632_v3 = vrot.slane %v3250_v50, %v2631_v2 }
 0x710   : > { %2592 = vbcast.lane.b32.xlu1 %v2590_v52, 256  ;;  %2585 = vbcast.lane.b32.xlu0 %v2583_v53, 256 }
 0x714   : > { %2599 = vbcast.lane.b32.xlu1 %v2597_v55, 256  ;;  %2613 = vbcast.lane.b32.xlu0 %v2611_v56, 256 }
 0x718   : > { %2606 = vbcast.lane.b32.xlu1 %v2604_v59, 256  ;;  %2627 = vbcast.lane.b32.xlu0 %v2625_v60, 256 }
 0x71c   : > { %2620 = vbcast.lane.b32.xlu1 %v2618_v10, 256 }
 0x720   : > { %2634 = vbcast.lane.b32.xlu1 %v2632_v3, 256 }
 0x782   : > { %v2593_v5 = vpop.permute.xlu1 %2592  ;;  %v2586_v8 = vpop.permute.xlu0 %2585 }
 0x783   : > { %v2637_v11 = vmul.f32 %v2593_v5, %v4015_v13  ;;  %v2636_v34 = vmul.f32 %v2586_v8, %v4005_v7 }
 0x785   : > { %2645 = vst.msk [vmem:[%s582_s27 + $0x8] sm:$0xff] %vm747_vm2, %v2637_v11  ;;  %2644 = vst.msk [vmem:[%s582_s27] sm:$0xff] %vm747_vm2, %v2636_v34 }
 0x786   : > { %v2600_v30 = vpop.permute.xlu1 %2599  ;;  %v2614_v14 = vpop.permute.xlu0 %2613 }
 0x787   : > { %v2638_v9 = vmul.f32 %v2600_v30, %v4002_v6  ;;  %v2640_v41 = vmul.f32 %v2614_v14, %v4026_v15 }
 0x789   : > { %2646 = vst.msk [vmem:[%s582_s27 + $0x10] sm:$0xff] %vm747_vm2, %v2638_v9  ;;  %2648 = vst.msk [vmem:[%s582_s27 + $0x20] sm:$0xff] %vm747_vm2, %v2640_v41 }
 0x78a   : > { %v2607_v13 = vpop.permute.xlu1 %2606  ;;  %v2628_v7 = vpop.permute.xlu0 %2627 }
 0x78b   : > { %v2639_v0 = vmul.f32 %v2607_v13, %v4012_v12  ;;  %v2642_v32 = vmul.f32 %v2628_v7, %v4040_v19 }
 0x78d   : > { %2647 = vst.msk [vmem:[%s582_s27 + $0x18] sm:$0xff] %vm747_vm2, %v2639_v0  ;;  %2650 = vst.msk [vmem:[%s582_s27 + $0x30] sm:$0xff] %vm747_vm2, %v2642_v32 }
 0x78e   : > { %v2621_v16 = vpop.permute.xlu1 %2620 }
 0x78f   : > { %v2641_v6 = vmul.f32 %v2621_v16, %v4033_v17 }
 0x791   : > { %2649 = vst.msk [vmem:[%s582_s27 + $0x28] sm:$0xff] %vm747_vm2, %v2641_v6 }
 0x792   : > { %v2635_v15 = vpop.permute.xlu1 %2634 }
 0x793   : > { %v2643_v12 = vmul.f32 %v2635_v15, %v4047_v21 }
 0x795   : > { %2651 = vst.msk [vmem:[%s582_s27 + $0x38] sm:$0xff] %vm747_vm2, %v2643_v12 }
 0x796   : > { %3408 = shalt.err (!%p3405_p9)
}
 0x797   : > { %s3409_s22 = scalar_lea.hbm %s4216_s29, 1024  ;;  %s3413_s1 = scalar_lea.hbm %s4324_s5, 2048 }
 0x798   : > { %p3410_p13 = scmp.ne.s32.totalorder %s4216_s29, %s3409_s22  ;;  %p3414_p12 = scmp.lt.u32.totalorder %s4216_s29, %s4324_s5 }
 0x799   : > { %p3415_p1 = scmp.lt.u32.totalorder %s3413_s1, %s3409_s22  ;;  %p3417_p4 = scmp.lt.u32.totalorder %s3409_s22, %s4216_s29 }
 0x79a   : > { %p3411_p11 = pnand %p3410_p13, %p3720_p5 }
 0x79b   : > { %p3416_p2 = por %p3415_p1, %p3414_p12 }
 0x79c   : > { %p3412_p7 = pneg %p3411_p11 }
 0x79d   : > { %p3418_p0 = por %p3417_p4, %p3416_p2 }
 0x79f   : > { %p3419_p8 = pnand %p3418_p0, %p3412_p7 }
 0x7a1   : > { %3422 = shalt.err (!%p3419_p8)
}
 0x7a2   : > { %s3489_s4 = smov 128   ;;  %s3490_s25 = smov 8  }
 0x7a3   : > { %3167 = dma.vmem_to_hbm [thread:$0]  (%p3720_p5), %s4218_s10, 1024, %s4216_s29, %s2653_s21, %s3489_s4, %s3489_s4, %s3490_s25  }
 0x7a4 PF: > { %s4325_s26 = sld [smem:[#allocation18_spill]]  ;;  %s4326_s13 = sld [smem:[#allocation19_spill]] }
 0x7a5   : > { %p4328_p10 = scmp.ge.s32.totalorder %s3473_s18, 2 }
 0x7aa   : > { %s2681_s19 = sand.u32 1, %s4325_s26   ;;  %p4327_p6 = scmp.ne.s32.totalorder %s4326_s13, 0 }
 0x7ab   : > { %s2682_s15 = scalar_lea.sflag [#allocation5], %s2681_s19 }
 0x7ac   : > { %p3187_p3 = pnand %p4328_p10, %p4327_p6 }
 0x7ae   : > { %3456 = dma.done.wait (!%p3187_p3), %s2682_s15, 1024  }
 0x7af   : > { %3458 = vsyncadd (!%p3187_p3), %s2682_s15, 4294966272  ;;  %p32_p9 = scmp.ge.s32.totalorder %s3706_s14, 4   ;;  %s4329_s15 = smov %s3465_s16 }
 0x7b0   : > { %s4330_s16 = smov %s3469_s17  ;;  %s4331_s17 = smov %s3716_s11 }
 0x7b1   : > { %s4332_s18 = smov %s3706_s14  ;;  %34 = sbr.rel (!%p32_p9) target bundleno = 19 (0x13), region = 161 }
 0x7b8   :  { %2687 = vsyncpa [#allocation4], 1 }
 0x7b9   :  { %2689 = vsyncpa [#allocation4 + $0x1], 1 }
 0x7ba   :  { %2690 = vsyncpa [#allocation7], 1 }
 0x7bb   :  { %2692 = vsyncpa [#allocation7 + $0x1], 1 }
 0x7bc   :  { %2693 = vsyncpa [#allocation10], 1 }
 0x7bd   :  { %2694 = vsyncpa [#allocation5], 1 }
 0x7be   :  { %2696 = vsyncpa [#allocation5 + $0x1], 1 }

</bundles_post_ra>
